<compile_context>
chip_gen: v6e
topology: v6e:2x2x1
jax: 0.10.0
libtpu: 0.0.40
codegen_flags: <defaults>
</compile_context>

<pallas_src>
import functools
import math

import jax
import jax.numpy as jnp
from jax import lax
from jax.experimental import pallas as pl
from jax.experimental.pallas import tpu as pltpu


def _round_up(x, m):
    return (x + m - 1) // m * m


def _resident_spec(shape):
    """Spec for a grid-invariant operand (constant index_map).

    Single-buffer it so large weights don't get two VMEM copies; fall back to
    the default (double-buffered) spec if this JAX build rejects the kwarg.
    """
    try:
        return pl.BlockSpec(shape, lambda i: (0, 0),
                            pipeline_mode=pl.Buffered(1))
    except (TypeError, AttributeError):
        return pl.BlockSpec(shape, lambda i: (0, 0))


def _lstm_kernel(x_ref, wih_ref, whh_ref, b_ref, wout_ref, bout_ref,
                 o_ref, pregate_scr, hbuf_scr, h_scr, c_scr, *, blk):
    """One sequence chunk of the LSTM recurrence + batched output head.

    x_ref       : (T, I)     input chunk (matmul dtype)
    wih_ref     : (I, 4*Hp)  input->gates weights, gate order (i,f,o,g), padded
    whh_ref     : (Hp, 4*Hp) hidden->gates weights, gate order (i,f,o,g), padded
    b_ref       : (1, 4*Hp)  combined bias (b_ih + b_hh), f32
    wout_ref    : (Hp, Op)   output linear weights, padded
    bout_ref    : (1, Op)    output linear bias, f32
    o_ref       : (T, Op)    ReLU(Linear(h_t)) per timestep (lane-dense store)
    pregate_scr : (T, 4*Hp)  f32  x@Wih + bias for the whole chunk
    hbuf_scr    : (T, Hp)    mm   h_t for every step (matmul dtype)
    h_scr       : (1, Hp)    mm   recurrent h (persists across grid steps)
    c_scr       : (1, Hp)    f32  recurrent c (persists across grid steps)
    blk         : static timestep block (8 rows f32 / 16 rows bf16)
    """
    Hp = c_scr.shape[1]
    T = x_ref.shape[0]
    mm_dtype = hbuf_scr.dtype

    @pl.when(pl.program_id(0) == 0)
    def _():
        h_scr[...] = jnp.zeros_like(h_scr)
        c_scr[...] = jnp.zeros_like(c_scr)

    # Hoisted input projection: one MXU-efficient (T, I) x (I, 4Hp) matmul.
    pregate_scr[...] = (
        jnp.dot(x_ref[...], wih_ref[...], preferred_element_type=jnp.float32)
        + b_ref[...])

    def block(b, carry):
        h, c = carry                                  # (1,Hp) mm / (1,Hp) f32
        base = pl.multiple_of(b * blk, blk)
        # One aligned (blk, 4Hp) load per block instead of per-step
        # dynamic-sublane loads.
        pre_blk = pregate_scr[pl.ds(base, blk), :]
        h_rows = []
        for j in range(blk):                          # statically unrolled
            # TODO(synk): hold Whh weight-stationary in the MXU across the
            # chunk (pltpu.matmul_push_rhs / matmul_acc_lhs / matmul_pop) so
            # each step is a single LHS-row push instead of re-streaming Whh.
            gates = (jnp.dot(h, whh_ref[...],
                             preferred_element_type=jnp.float32)
                     + pre_blk[j:j + 1, :])           # (1, 4Hp) f32
            # Gate order (i, f, o, g): one sigmoid over 3*Hp, one tanh over Hp.
            sig = jax.nn.sigmoid(gates[:, :3 * Hp])
            i_g = sig[:, 0 * Hp:1 * Hp]
            f_g = sig[:, 1 * Hp:2 * Hp]
            o_g = sig[:, 2 * Hp:3 * Hp]
            g_g = jnp.tanh(gates[:, 3 * Hp:4 * Hp])
            c = f_g * c + i_g * g_g                   # f32
            h = (o_g * jnp.tanh(c)).astype(mm_dtype)  # matmul dtype for reuse
            h_rows.append(h)
        # Single aligned (blk, Hp) store per block.
        hbuf_scr[pl.ds(base, blk), :] = jnp.concatenate(h_rows, axis=0)
        return h, c

    h_fin, c_fin = lax.fori_loop(0, T // blk, block, (h_scr[...], c_scr[...]))
    h_scr[...] = h_fin
    c_scr[...] = c_fin

    # Batched output head + ReLU: one matmul, one contiguous lane-dense store.
    y = (jnp.dot(hbuf_scr[...], wout_ref[...],
                 preferred_element_type=jnp.float32) + bout_ref[...])
    o_ref[...] = jnp.maximum(y, 0.0).astype(o_ref.dtype)


def lstm_forward(x, params, conditioning_frames=0, *, chunk=512,
                 matmul_dtype=jnp.bfloat16):
    """x: (1, S, I) float32 (batch_first; batch must be 1 to match .squeeze(0))."""
    assert x.shape[0] == 1, "PyTorch forward squeezes dim 0 -> batch must be 1"
    # TODO(synk): with batch==1 there is no independent work to shard onto the
    # second TensorCore on v7x; one TC idles for this module as specified.
    x2d = x[0].astype(jnp.float32)                          # (S, I)
    S, I = x2d.shape
    w_ih, w_hh = params["w_ih"], params["w_hh"]
    b_ih, b_hh = params["b_ih"], params["b_hh"]
    w_out, b_out = params["w_out"], params["b_out"]
    H = w_hh.shape[1]
    O = w_out.shape[0]

    Hp = _round_up(H, 128)       # per-gate lane padding -> vreg-aligned slices
    Op = _round_up(O, 128)       # lane-dense output store
    itemsize = jnp.dtype(matmul_dtype).itemsize
    BLK = 16 if itemsize <= 2 else 8   # native sublane tile for h storage

    # ---- glue: repack gates torch (i,f,g,o) -> kernel (i,f,o,g), pad each
    #      gate block to Hp lanes, pre-transpose to (in, out), fold the two
    #      biases. Pad lanes are exact zeros and stay zero in the recurrence
    #      (g_pad == 0 -> c_pad == 0, h_pad == 0).
    perm = jnp.array([0, 1, 3, 2])
    wih4 = jnp.zeros((4, Hp, I), jnp.float32).at[:, :H, :].set(
        w_ih.reshape(4, H, I)[perm])
    wih_p = wih4.transpose(2, 0, 1).reshape(I, 4 * Hp)       # (I, 4Hp)

    whh4 = jnp.zeros((4, Hp, Hp), jnp.float32).at[:, :H, :H].set(
        w_hh.reshape(4, H, H)[perm])
    whh_p = whh4.transpose(2, 0, 1).reshape(Hp, 4 * Hp)      # (Hp, 4Hp)

    bias_p = jnp.zeros((4, Hp), jnp.float32).at[:, :H].set(
        (b_ih + b_hh).reshape(4, H)[perm]).reshape(1, 4 * Hp)

    wout_p = jnp.zeros((Hp, Op), jnp.float32).at[:H, :O].set(w_out.T)
    bout_p = jnp.zeros((1, Op), jnp.float32).at[0, :O].set(b_out)

    # ---- generation-aware VMEM budget (v5e/v6e: 128 MiB, v7x: 64 MiB).
    try:
        phys_vmem = int(getattr(pltpu.get_tpu_info(), "vmem_capacity_bytes",
                                128 << 20))
    except Exception:
        phys_vmem = 128 << 20
    vmem_cap = (phys_vmem * 3) // 4          # leave headroom (~48 MiB on v7x)

    def footprint(t):
        weights = ((I * 4 * Hp + Hp * 4 * Hp + Hp * Op) * itemsize
                   + (4 * Hp + Op) * 4)                       # single-buffered
        io = 2 * t * I * itemsize + 2 * t * Op * 4            # 2x-buffered x/out
        scratch = t * 4 * Hp * 4 + t * Hp * itemsize + Hp * itemsize + Hp * 4
        return weights + io + scratch

    # ---- chunk the sequence; zero-pad trailing frames (outputs sliced off);
    #      shrink the chunk until it fits the physical VMEM budget.
    T = _round_up(min(chunk, _round_up(S, BLK)), BLK)
    while T > BLK and footprint(T) > vmem_cap:
        T = max(BLK, _round_up(T // 2, BLK))
    # Never clamp the limit below the computed footprint (+25% margin); cap at
    # the physical budget of this generation.
    vmem_limit = int(min(vmem_cap, max(32 << 20, footprint(T) * 5 // 4)))

    S_pad = _round_up(S, T)
    x_p = jnp.zeros((S_pad, I), jnp.float32).at[:S].set(x2d)

    # matmul-dtype operands; c state, gates and accumulation stay f32 in-kernel.
    x_p = x_p.astype(matmul_dtype)
    wih_p = wih_p.astype(matmul_dtype)
    whh_p = whh_p.astype(matmul_dtype)
    wout_p = wout_p.astype(matmul_dtype)

    n_chunks = S_pad // T

    out = pl.pallas_call(
        functools.partial(_lstm_kernel, blk=BLK),
        out_shape=jax.ShapeDtypeStruct((S_pad, Op), jnp.float32),
        grid=(n_chunks,),
        in_specs=[
            pl.BlockSpec((T, I), lambda i: (i, 0)),          # x chunk (pipelined)
            _resident_spec((I, 4 * Hp)),                     # Wih (resident)
            _resident_spec((Hp, 4 * Hp)),                    # Whh (resident)
            _resident_spec((1, 4 * Hp)),                     # bias
            _resident_spec((Hp, Op)),                        # Wout
            _resident_spec((1, Op)),                         # bout
        ],
        out_specs=pl.BlockSpec((T, Op), lambda i: (i, 0)),
        scratch_shapes=[
            pltpu.VMEM((T, 4 * Hp), jnp.float32),            # precomputed gates
            pltpu.VMEM((T, Hp), matmul_dtype),               # h per step
            pltpu.VMEM((1, Hp), matmul_dtype),               # h state
            pltpu.VMEM((1, Hp), jnp.float32),                # c state
        ],
        compiler_params=pltpu.CompilerParams(
            dimension_semantics=("arbitrary",),              # recurrence carries state
            vmem_limit_bytes=vmem_limit),
    )(x_p, wih_p, whh_p, bias_p, wout_p, bout_p)

    return out[conditioning_frames:S, :O]


def init_params(key, input_size, hidden_size, output_size):
    """Deterministic init matching the PyTorch parameter shapes."""
    k = 1.0 / math.sqrt(hidden_size)
    keys = jax.random.split(key, 6)
    u = lambda kk, shape: jax.random.uniform(kk, shape, jnp.float32, -k, k)
    return {
        "w_ih": u(keys[0], (4 * hidden_size, input_size)),
        "w_hh": u(keys[1], (4 * hidden_size, hidden_size)),
        "b_ih": u(keys[2], (4 * hidden_size,)),
        "b_hh": u(keys[3], (4 * hidden_size,)),
        "w_out": u(keys[4], (output_size, hidden_size)),
        "b_out": u(keys[5], (output_size,)),
    }


def _reference(x, params, conditioning_frames):
    """Pure-JAX f32 reference of the PyTorch forward, for validation."""
    x2d = x[0]
    H = params["w_hh"].shape[1]

    def cell(carry, x_t):
        h, c = carry
        gates = (x_t @ params["w_ih"].T + params["b_ih"]
                 + h @ params["w_hh"].T + params["b_hh"])
        i = jax.nn.sigmoid(gates[0 * H:1 * H])
        f = jax.nn.sigmoid(gates[1 * H:2 * H])
        g = jnp.tanh(gates[2 * H:3 * H])
        o = jax.nn.sigmoid(gates[3 * H:4 * H])
        c = f * c + i * g
        h = o * jnp.tanh(c)
        return (h, c), h

    init = (jnp.zeros((H,), jnp.float32), jnp.zeros((H,), jnp.float32))
    _, hs = lax.scan(cell, init, x2d)
    y = jnp.maximum(hs @ params["w_out"].T + params["b_out"], 0.0)
    return y[conditioning_frames:]


if __name__ == "__main__":
    input_size = 16
    hidden_size = 32
    output_size = 8
    seq = 8
    conditioning_frames = 2

    key = jax.random.PRNGKey(0)
    kx, kp = jax.random.split(key)
    x = jax.random.normal(kx, (1, seq, input_size), jnp.float32)  # (batch=1, S, I)
    params = init_params(kp, input_size, hidden_size, output_size)

    y_ref = _reference(x, params, conditioning_frames)

    # f32 matmul path: must match the reference tightly.
    y32 = jax.block_until_ready(
        lstm_forward(x, params, conditioning_frames, matmul_dtype=jnp.float32))
    assert y32.shape == (seq - conditioning_frames, output_size)
    assert jnp.allclose(y32, y_ref, rtol=1e-4, atol=1e-4)

    # default bf16 matmul path: loosened (sequence-length-dependent) tolerance.
    y = jax.block_until_ready(lstm_forward(x, params, conditioning_frames))
    assert y.shape == (seq - conditioning_frames, output_size)
    assert jnp.allclose(y, y_ref, rtol=2e-2, atol=2e-2)

    print("KERNEL_OK")
</pallas_src>

<mosaic_0001>
module attributes {stable_mosaic.version = 11 : i64} {
  func.func @_lstm_kernel(%arg0: i32, %arg1: memref<8x16xf32, #tpu.memory_space<vmem>>, %arg2: memref<16x512xf32, #tpu.memory_space<vmem>>, %arg3: memref<128x512xf32, #tpu.memory_space<vmem>>, %arg4: memref<1x512xf32, #tpu.memory_space<vmem>>, %arg5: memref<128x128xf32, #tpu.memory_space<vmem>>, %arg6: memref<1x128xf32, #tpu.memory_space<vmem>>, %arg7: memref<8x128xf32, #tpu.memory_space<vmem>>, %arg8: memref<8x512xf32, #tpu.memory_space<vmem>>, %arg9: memref<8x128xf32, #tpu.memory_space<vmem>>, %arg10: memref<1x128xf32, #tpu.memory_space<vmem>>, %arg11: memref<1x128xf32, #tpu.memory_space<vmem>>) attributes {dimension_semantics = [#tpu.dimension_semantics<arbitrary>], iteration_bounds = array<i64: 1>, scalar_prefetch = 0 : i64, scratch_operands = 4 : i64, tpu.core_type = #tpu.core_type<tc>, window_params = [{transform_indices = @transform_0, window_bounds = array<i64: 8, 16>}, {pipeline_mode = #tpu.pipeline_mode<synchronous>, transform_indices = @transform_1, window_bounds = array<i64: 16, 512>}, {pipeline_mode = #tpu.pipeline_mode<synchronous>, transform_indices = @transform_2, window_bounds = array<i64: 128, 512>}, {pipeline_mode = #tpu.pipeline_mode<synchronous>, transform_indices = @transform_3, window_bounds = array<i64: 1, 512>}, {pipeline_mode = #tpu.pipeline_mode<synchronous>, transform_indices = @transform_4, window_bounds = array<i64: 128, 128>}, {pipeline_mode = #tpu.pipeline_mode<synchronous>, transform_indices = @transform_5, window_bounds = array<i64: 1, 128>}, {transform_indices = @transform_6, window_bounds = array<i64: 8, 128>}]} {
    %c0_i32 = arith.constant 0 : i32
    %0 = arith.cmpi eq, %arg0, %c0_i32 : i32
    %1 = arith.extui %0 : i1 to i32
    %c0_i32_0 = arith.constant 0 : i32
    %2 = arith.cmpi ne, %1, %c0_i32_0 : i32
    scf.if %2 {
      %cst_61 = arith.constant 0.000000e+00 : f32
      %190 = vector.broadcast %cst_61 : f32 to vector<1x128xf32>
      %c0_62 = arith.constant 0 : index
      %c0_63 = arith.constant 0 : index
      %191 = vector.load %arg10[%c0_62, %c0_63] : memref<1x128xf32, #tpu.memory_space<vmem>>, vector<1x128xf32>
      tpu.vector_store %arg10[%c0_62, %c0_63], %190 {strides = array<i32>} : memref<1x128xf32, #tpu.memory_space<vmem>>, vector<1x128xf32>,
      %cst_64 = arith.constant 0.000000e+00 : f32
      %192 = vector.broadcast %cst_64 : f32 to vector<1x128xf32>
      %c0_65 = arith.constant 0 : index
      %c0_66 = arith.constant 0 : index
      %193 = vector.load %arg11[%c0_65, %c0_66] : memref<1x128xf32, #tpu.memory_space<vmem>>, vector<1x128xf32>
      tpu.vector_store %arg11[%c0_65, %c0_66], %192 {strides = array<i32>} : memref<1x128xf32, #tpu.memory_space<vmem>>, vector<1x128xf32>,
    } else {
    }
    %c0 = arith.constant 0 : index
    %c0_1 = arith.constant 0 : index
    %3 = vector.load %arg1[%c0, %c0_1] : memref<8x16xf32, #tpu.memory_space<vmem>>, vector<8x16xf32>
    %c0_2 = arith.constant 0 : index
    %c0_3 = arith.constant 0 : index
    %4 = vector.load %arg2[%c0_2, %c0_3] : memref<16x512xf32, #tpu.memory_space<vmem>>, vector<16x512xf32>
    %cst = arith.constant dense<0.000000e+00> : vector<8x512xf32>
    %5 = tpu.matmul %3, %4, %cst {dimension_numbers = #tpu.dot_dimension_numbers<[1], [0], [0], [1], [0, 0, 1, 1], [], []>} : vector<8x16xf32>, vector<16x512xf32>, vector<8x512xf32> -> vector<8x512xf32>
    %c0_4 = arith.constant 0 : index
    %c0_5 = arith.constant 0 : index
    %6 = vector.load %arg4[%c0_4, %c0_5] : memref<1x512xf32, #tpu.memory_space<vmem>>, vector<1x512xf32>
    %7 = vector.broadcast %6 : vector<1x512xf32> to vector<8x512xf32>
    %8 = arith.addf %5, %7 : vector<8x512xf32>
    %c0_6 = arith.constant 0 : index
    %c0_7 = arith.constant 0 : index
    %9 = vector.load %arg8[%c0_6, %c0_7] : memref<8x512xf32, #tpu.memory_space<vmem>>, vector<8x512xf32>
    tpu.vector_store %arg8[%c0_6, %c0_7], %8 {strides = array<i32>} : memref<8x512xf32, #tpu.memory_space<vmem>>, vector<8x512xf32>,
    %c0_8 = arith.constant 0 : index
    %c0_9 = arith.constant 0 : index
    %10 = vector.load %arg10[%c0_8, %c0_9] : memref<1x128xf32, #tpu.memory_space<vmem>>, vector<1x128xf32>
    %c0_10 = arith.constant 0 : index
    %c0_11 = arith.constant 0 : index
    %11 = vector.load %arg11[%c0_10, %c0_11] : memref<1x128xf32, #tpu.memory_space<vmem>>, vector<1x128xf32>
    %c0_i32_12 = arith.constant 0 : i32
    %c8_i32 = arith.constant 8 : i32
    %12 = arith.muli %c0_i32_12, %c8_i32 : i32
    %13 = tpu.assume_multiple %12, 8 : i32
    %14 = arith.index_cast %13 : i32 to index
    %c0_13 = arith.constant 0 : index
    %15 = vector.load %arg8[%14, %c0_13] : memref<8x512xf32, #tpu.memory_space<vmem>>, vector<8x512xf32>
    %c0_14 = arith.constant 0 : index
    %c0_15 = arith.constant 0 : index
    %16 = vector.load %arg3[%c0_14, %c0_15] : memref<128x512xf32, #tpu.memory_space<vmem>>, vector<128x512xf32>
    %cst_16 = arith.constant dense<0.000000e+00> : vector<1x512xf32>
    %17 = tpu.matmul %10, %16, %cst_16 {dimension_numbers = #tpu.dot_dimension_numbers<[1], [0], [0], [1], [0, 0, 1, 1], [], []>} : vector<1x128xf32>, vector<128x512xf32>, vector<1x512xf32> -> vector<1x512xf32>
    %18 = vector.extract_strided_slice %15 {offsets = [0, 0], sizes = [1, 512], strides = [1, 1]} : vector<8x512xf32> to vector<1x512xf32>
    %19 = arith.addf %17, %18 : vector<1x512xf32>
    %20 = vector.extract_strided_slice %19 {offsets = [0, 0], sizes = [1, 384], strides = [1, 1]} : vector<1x512xf32> to vector<1x384xf32>
    %21 = arith.negf %20 : vector<1x384xf32>
    %22 = math.exp %21 : vector<1x384xf32>
    %cst_17 = arith.constant 1.000000e+00 : f32
    %23 = vector.broadcast %cst_17 : f32 to vector<1x384xf32>
    %24 = arith.addf %23, %22 : vector<1x384xf32>
    %25 = arith.divf %23, %24 : vector<1x384xf32>
    %26 = vector.extract_strided_slice %25 {offsets = [0, 0], sizes = [1, 128], strides = [1, 1]} : vector<1x384xf32> to vector<1x128xf32>
    %27 = vector.extract_strided_slice %25 {offsets = [0, 128], sizes = [1, 128], strides = [1, 1]} : vector<1x384xf32> to vector<1x128xf32>
    %28 = vector.extract_strided_slice %25 {offsets = [0, 256], sizes = [1, 128], strides = [1, 1]} : vector<1x384xf32> to vector<1x128xf32>
    %29 = vector.extract_strided_slice %19 {offsets = [0, 384], sizes = [1, 128], strides = [1, 1]} : vector<1x512xf32> to vector<1x128xf32>
    %30 = math.tanh %29 : vector<1x128xf32>
    %31 = arith.mulf %27, %11 : vector<1x128xf32>
    %32 = arith.mulf %26, %30 : vector<1x128xf32>
    %33 = arith.addf %31, %32 : vector<1x128xf32>
    %34 = math.tanh %33 : vector<1x128xf32>
    %35 = arith.mulf %28, %34 : vector<1x128xf32>
    %c0_18 = arith.constant 0 : index
    %c0_19 = arith.constant 0 : index
    %36 = vector.load %arg3[%c0_18, %c0_19] : memref<128x512xf32, #tpu.memory_space<vmem>>, vector<128x512xf32>
    %cst_20 = arith.constant dense<0.000000e+00> : vector<1x512xf32>
    %37 = tpu.matmul %35, %36, %cst_20 {dimension_numbers = #tpu.dot_dimension_numbers<[1], [0], [0], [1], [0, 0, 1, 1], [], []>} : vector<1x128xf32>, vector<128x512xf32>, vector<1x512xf32> -> vector<1x512xf32>
    %38 = vector.extract_strided_slice %15 {offsets = [1, 0], sizes = [1, 512], strides = [1, 1]} : vector<8x512xf32> to vector<1x512xf32>
    %39 = arith.addf %37, %38 : vector<1x512xf32>
    %40 = vector.extract_strided_slice %39 {offsets = [0, 0], sizes = [1, 384], strides = [1, 1]} : vector<1x512xf32> to vector<1x384xf32>
    %41 = arith.negf %40 : vector<1x384xf32>
    %42 = math.exp %41 : vector<1x384xf32>
    %cst_21 = arith.constant 1.000000e+00 : f32
    %43 = vector.broadcast %cst_21 : f32 to vector<1x384xf32>
    %44 = arith.addf %43, %42 : vector<1x384xf32>
    %45 = arith.divf %43, %44 : vector<1x384xf32>
    %46 = vector.extract_strided_slice %45 {offsets = [0, 0], sizes = [1, 128], strides = [1, 1]} : vector<1x384xf32> to vector<1x128xf32>
    %47 = vector.extract_strided_slice %45 {offsets = [0, 128], sizes = [1, 128], strides = [1, 1]} : vector<1x384xf32> to vector<1x128xf32>
    %48 = vector.extract_strided_slice %45 {offsets = [0, 256], sizes = [1, 128], strides = [1, 1]} : vector<1x384xf32> to vector<1x128xf32>
    %49 = vector.extract_strided_slice %39 {offsets = [0, 384], sizes = [1, 128], strides = [1, 1]} : vector<1x512xf32> to vector<1x128xf32>
    %50 = math.tanh %49 : vector<1x128xf32>
    %51 = arith.mulf %47, %33 : vector<1x128xf32>
    %52 = arith.mulf %46, %50 : vector<1x128xf32>
    %53 = arith.addf %51, %52 : vector<1x128xf32>
    %54 = math.tanh %53 : vector<1x128xf32>
    %55 = arith.mulf %48, %54 : vector<1x128xf32>
    %c0_22 = arith.constant 0 : index
    %c0_23 = arith.constant 0 : index
    %56 = vector.load %arg3[%c0_22, %c0_23] : memref<128x512xf32, #tpu.memory_space<vmem>>, vector<128x512xf32>
    %cst_24 = arith.constant dense<0.000000e+00> : vector<1x512xf32>
    %57 = tpu.matmul %55, %56, %cst_24 {dimension_numbers = #tpu.dot_dimension_numbers<[1], [0], [0], [1], [0, 0, 1, 1], [], []>} : vector<1x128xf32>, vector<128x512xf32>, vector<1x512xf32> -> vector<1x512xf32>
    %58 = vector.extract_strided_slice %15 {offsets = [2, 0], sizes = [1, 512], strides = [1, 1]} : vector<8x512xf32> to vector<1x512xf32>
    %59 = arith.addf %57, %58 : vector<1x512xf32>
    %60 = vector.extract_strided_slice %59 {offsets = [0, 0], sizes = [1, 384], strides = [1, 1]} : vector<1x512xf32> to vector<1x384xf32>
    %61 = arith.negf %60 : vector<1x384xf32>
    %62 = math.exp %61 : vector<1x384xf32>
    %cst_25 = arith.constant 1.000000e+00 : f32
    %63 = vector.broadcast %cst_25 : f32 to vector<1x384xf32>
    %64 = arith.addf %63, %62 : vector<1x384xf32>
    %65 = arith.divf %63, %64 : vector<1x384xf32>
    %66 = vector.extract_strided_slice %65 {offsets = [0, 0], sizes = [1, 128], strides = [1, 1]} : vector<1x384xf32> to vector<1x128xf32>
    %67 = vector.extract_strided_slice %65 {offsets = [0, 128], sizes = [1, 128], strides = [1, 1]} : vector<1x384xf32> to vector<1x128xf32>
    %68 = vector.extract_strided_slice %65 {offsets = [0, 256], sizes = [1, 128], strides = [1, 1]} : vector<1x384xf32> to vector<1x128xf32>
    %69 = vector.extract_strided_slice %59 {offsets = [0, 384], sizes = [1, 128], strides = [1, 1]} : vector<1x512xf32> to vector<1x128xf32>
    %70 = math.tanh %69 : vector<1x128xf32>
    %71 = arith.mulf %67, %53 : vector<1x128xf32>
    %72 = arith.mulf %66, %70 : vector<1x128xf32>
    %73 = arith.addf %71, %72 : vector<1x128xf32>
    %74 = math.tanh %73 : vector<1x128xf32>
    %75 = arith.mulf %68, %74 : vector<1x128xf32>
    %c0_26 = arith.constant 0 : index
    %c0_27 = arith.constant 0 : index
    %76 = vector.load %arg3[%c0_26, %c0_27] : memref<128x512xf32, #tpu.memory_space<vmem>>, vector<128x512xf32>
    %cst_28 = arith.constant dense<0.000000e+00> : vector<1x512xf32>
    %77 = tpu.matmul %75, %76, %cst_28 {dimension_numbers = #tpu.dot_dimension_numbers<[1], [0], [0], [1], [0, 0, 1, 1], [], []>} : vector<1x128xf32>, vector<128x512xf32>, vector<1x512xf32> -> vector<1x512xf32>
    %78 = vector.extract_strided_slice %15 {offsets = [3, 0], sizes = [1, 512], strides = [1, 1]} : vector<8x512xf32> to vector<1x512xf32>
    %79 = arith.addf %77, %78 : vector<1x512xf32>
    %80 = vector.extract_strided_slice %79 {offsets = [0, 0], sizes = [1, 384], strides = [1, 1]} : vector<1x512xf32> to vector<1x384xf32>
    %81 = arith.negf %80 : vector<1x384xf32>
    %82 = math.exp %81 : vector<1x384xf32>
    %cst_29 = arith.constant 1.000000e+00 : f32
    %83 = vector.broadcast %cst_29 : f32 to vector<1x384xf32>
    %84 = arith.addf %83, %82 : vector<1x384xf32>
    %85 = arith.divf %83, %84 : vector<1x384xf32>
    %86 = vector.extract_strided_slice %85 {offsets = [0, 0], sizes = [1, 128], strides = [1, 1]} : vector<1x384xf32> to vector<1x128xf32>
    %87 = vector.extract_strided_slice %85 {offsets = [0, 128], sizes = [1, 128], strides = [1, 1]} : vector<1x384xf32> to vector<1x128xf32>
    %88 = vector.extract_strided_slice %85 {offsets = [0, 256], sizes = [1, 128], strides = [1, 1]} : vector<1x384xf32> to vector<1x128xf32>
    %89 = vector.extract_strided_slice %79 {offsets = [0, 384], sizes = [1, 128], strides = [1, 1]} : vector<1x512xf32> to vector<1x128xf32>
    %90 = math.tanh %89 : vector<1x128xf32>
    %91 = arith.mulf %87, %73 : vector<1x128xf32>
    %92 = arith.mulf %86, %90 : vector<1x128xf32>
    %93 = arith.addf %91, %92 : vector<1x128xf32>
    %94 = math.tanh %93 : vector<1x128xf32>
    %95 = arith.mulf %88, %94 : vector<1x128xf32>
    %c0_30 = arith.constant 0 : index
    %c0_31 = arith.constant 0 : index
    %96 = vector.load %arg3[%c0_30, %c0_31] : memref<128x512xf32, #tpu.memory_space<vmem>>, vector<128x512xf32>
    %cst_32 = arith.constant dense<0.000000e+00> : vector<1x512xf32>
    %97 = tpu.matmul %95, %96, %cst_32 {dimension_numbers = #tpu.dot_dimension_numbers<[1], [0], [0], [1], [0, 0, 1, 1], [], []>} : vector<1x128xf32>, vector<128x512xf32>, vector<1x512xf32> -> vector<1x512xf32>
    %98 = vector.extract_strided_slice %15 {offsets = [4, 0], sizes = [1, 512], strides = [1, 1]} : vector<8x512xf32> to vector<1x512xf32>
    %99 = arith.addf %97, %98 : vector<1x512xf32>
    %100 = vector.extract_strided_slice %99 {offsets = [0, 0], sizes = [1, 384], strides = [1, 1]} : vector<1x512xf32> to vector<1x384xf32>
    %101 = arith.negf %100 : vector<1x384xf32>
    %102 = math.exp %101 : vector<1x384xf32>
    %cst_33 = arith.constant 1.000000e+00 : f32
    %103 = vector.broadcast %cst_33 : f32 to vector<1x384xf32>
    %104 = arith.addf %103, %102 : vector<1x384xf32>
    %105 = arith.divf %103, %104 : vector<1x384xf32>
    %106 = vector.extract_strided_slice %105 {offsets = [0, 0], sizes = [1, 128], strides = [1, 1]} : vector<1x384xf32> to vector<1x128xf32>
    %107 = vector.extract_strided_slice %105 {offsets = [0, 128], sizes = [1, 128], strides = [1, 1]} : vector<1x384xf32> to vector<1x128xf32>
    %108 = vector.extract_strided_slice %105 {offsets = [0, 256], sizes = [1, 128], strides = [1, 1]} : vector<1x384xf32> to vector<1x128xf32>
    %109 = vector.extract_strided_slice %99 {offsets = [0, 384], sizes = [1, 128], strides = [1, 1]} : vector<1x512xf32> to vector<1x128xf32>
    %110 = math.tanh %109 : vector<1x128xf32>
    %111 = arith.mulf %107, %93 : vector<1x128xf32>
    %112 = arith.mulf %106, %110 : vector<1x128xf32>
    %113 = arith.addf %111, %112 : vector<1x128xf32>
    %114 = math.tanh %113 : vector<1x128xf32>
    %115 = arith.mulf %108, %114 : vector<1x128xf32>
    %c0_34 = arith.constant 0 : index
    %c0_35 = arith.constant 0 : index
    %116 = vector.load %arg3[%c0_34, %c0_35] : memref<128x512xf32, #tpu.memory_space<vmem>>, vector<128x512xf32>
    %cst_36 = arith.constant dense<0.000000e+00> : vector<1x512xf32>
    %117 = tpu.matmul %115, %116, %cst_36 {dimension_numbers = #tpu.dot_dimension_numbers<[1], [0], [0], [1], [0, 0, 1, 1], [], []>} : vector<1x128xf32>, vector<128x512xf32>, vector<1x512xf32> -> vector<1x512xf32>
    %118 = vector.extract_strided_slice %15 {offsets = [5, 0], sizes = [1, 512], strides = [1, 1]} : vector<8x512xf32> to vector<1x512xf32>
    %119 = arith.addf %117, %118 : vector<1x512xf32>
    %120 = vector.extract_strided_slice %119 {offsets = [0, 0], sizes = [1, 384], strides = [1, 1]} : vector<1x512xf32> to vector<1x384xf32>
    %121 = arith.negf %120 : vector<1x384xf32>
    %122 = math.exp %121 : vector<1x384xf32>
    %cst_37 = arith.constant 1.000000e+00 : f32
    %123 = vector.broadcast %cst_37 : f32 to vector<1x384xf32>
    %124 = arith.addf %123, %122 : vector<1x384xf32>
    %125 = arith.divf %123, %124 : vector<1x384xf32>
    %126 = vector.extract_strided_slice %125 {offsets = [0, 0], sizes = [1, 128], strides = [1, 1]} : vector<1x384xf32> to vector<1x128xf32>
    %127 = vector.extract_strided_slice %125 {offsets = [0, 128], sizes = [1, 128], strides = [1, 1]} : vector<1x384xf32> to vector<1x128xf32>
    %128 = vector.extract_strided_slice %125 {offsets = [0, 256], sizes = [1, 128], strides = [1, 1]} : vector<1x384xf32> to vector<1x128xf32>
    %129 = vector.extract_strided_slice %119 {offsets = [0, 384], sizes = [1, 128], strides = [1, 1]} : vector<1x512xf32> to vector<1x128xf32>
    %130 = math.tanh %129 : vector<1x128xf32>
    %131 = arith.mulf %127, %113 : vector<1x128xf32>
    %132 = arith.mulf %126, %130 : vector<1x128xf32>
    %133 = arith.addf %131, %132 : vector<1x128xf32>
    %134 = math.tanh %133 : vector<1x128xf32>
    %135 = arith.mulf %128, %134 : vector<1x128xf32>
    %c0_38 = arith.constant 0 : index
    %c0_39 = arith.constant 0 : index
    %136 = vector.load %arg3[%c0_38, %c0_39] : memref<128x512xf32, #tpu.memory_space<vmem>>, vector<128x512xf32>
    %cst_40 = arith.constant dense<0.000000e+00> : vector<1x512xf32>
    %137 = tpu.matmul %135, %136, %cst_40 {dimension_numbers = #tpu.dot_dimension_numbers<[1], [0], [0], [1], [0, 0, 1, 1], [], []>} : vector<1x128xf32>, vector<128x512xf32>, vector<1x512xf32> -> vector<1x512xf32>
    %138 = vector.extract_strided_slice %15 {offsets = [6, 0], sizes = [1, 512], strides = [1, 1]} : vector<8x512xf32> to vector<1x512xf32>
    %139 = arith.addf %137, %138 : vector<1x512xf32>
    %140 = vector.extract_strided_slice %139 {offsets = [0, 0], sizes = [1, 384], strides = [1, 1]} : vector<1x512xf32> to vector<1x384xf32>
    %141 = arith.negf %140 : vector<1x384xf32>
    %142 = math.exp %141 : vector<1x384xf32>
    %cst_41 = arith.constant 1.000000e+00 : f32
    %143 = vector.broadcast %cst_41 : f32 to vector<1x384xf32>
    %144 = arith.addf %143, %142 : vector<1x384xf32>
    %145 = arith.divf %143, %144 : vector<1x384xf32>
    %146 = vector.extract_strided_slice %145 {offsets = [0, 0], sizes = [1, 128], strides = [1, 1]} : vector<1x384xf32> to vector<1x128xf32>
    %147 = vector.extract_strided_slice %145 {offsets = [0, 128], sizes = [1, 128], strides = [1, 1]} : vector<1x384xf32> to vector<1x128xf32>
    %148 = vector.extract_strided_slice %145 {offsets = [0, 256], sizes = [1, 128], strides = [1, 1]} : vector<1x384xf32> to vector<1x128xf32>
    %149 = vector.extract_strided_slice %139 {offsets = [0, 384], sizes = [1, 128], strides = [1, 1]} : vector<1x512xf32> to vector<1x128xf32>
    %150 = math.tanh %149 : vector<1x128xf32>
    %151 = arith.mulf %147, %133 : vector<1x128xf32>
    %152 = arith.mulf %146, %150 : vector<1x128xf32>
    %153 = arith.addf %151, %152 : vector<1x128xf32>
    %154 = math.tanh %153 : vector<1x128xf32>
    %155 = arith.mulf %148, %154 : vector<1x128xf32>
    %c0_42 = arith.constant 0 : index
    %c0_43 = arith.constant 0 : index
    %156 = vector.load %arg3[%c0_42, %c0_43] : memref<128x512xf32, #tpu.memory_space<vmem>>, vector<128x512xf32>
    %cst_44 = arith.constant dense<0.000000e+00> : vector<1x512xf32>
    %157 = tpu.matmul %155, %156, %cst_44 {dimension_numbers = #tpu.dot_dimension_numbers<[1], [0], [0], [1], [0, 0, 1, 1], [], []>} : vector<1x128xf32>, vector<128x512xf32>, vector<1x512xf32> -> vector<1x512xf32>
    %158 = vector.extract_strided_slice %15 {offsets = [7, 0], sizes = [1, 512], strides = [1, 1]} : vector<8x512xf32> to vector<1x512xf32>
    %159 = arith.addf %157, %158 : vector<1x512xf32>
    %160 = vector.extract_strided_slice %159 {offsets = [0, 0], sizes = [1, 384], strides = [1, 1]} : vector<1x512xf32> to vector<1x384xf32>
    %161 = arith.negf %160 : vector<1x384xf32>
    %162 = math.exp %161 : vector<1x384xf32>
    %cst_45 = arith.constant 1.000000e+00 : f32
    %163 = vector.broadcast %cst_45 : f32 to vector<1x384xf32>
    %164 = arith.addf %163, %162 : vector<1x384xf32>
    %165 = arith.divf %163, %164 : vector<1x384xf32>
    %166 = vector.extract_strided_slice %165 {offsets = [0, 0], sizes = [1, 128], strides = [1, 1]} : vector<1x384xf32> to vector<1x128xf32>
    %167 = vector.extract_strided_slice %165 {offsets = [0, 128], sizes = [1, 128], strides = [1, 1]} : vector<1x384xf32> to vector<1x128xf32>
    %168 = vector.extract_strided_slice %165 {offsets = [0, 256], sizes = [1, 128], strides = [1, 1]} : vector<1x384xf32> to vector<1x128xf32>
    %169 = vector.extract_strided_slice %159 {offsets = [0, 384], sizes = [1, 128], strides = [1, 1]} : vector<1x512xf32> to vector<1x128xf32>
    %170 = math.tanh %169 : vector<1x128xf32>
    %171 = arith.mulf %167, %153 : vector<1x128xf32>
    %172 = arith.mulf %166, %170 : vector<1x128xf32>
    %173 = arith.addf %171, %172 : vector<1x128xf32>
    %174 = math.tanh %173 : vector<1x128xf32>
    %175 = arith.mulf %168, %174 : vector<1x128xf32>
    %176 = tpu.concatenate %35, %55, %75, %95, %115, %135, %155, %175 in 0 : vector<1x128xf32>, vector<1x128xf32>, vector<1x128xf32>, vector<1x128xf32>, vector<1x128xf32>, vector<1x128xf32>, vector<1x128xf32>, vector<1x128xf32> -> vector<8x128xf32>
    %177 = arith.index_cast %13 : i32 to index
    %c0_46 = arith.constant 0 : index
    %178 = vector.load %arg9[%177, %c0_46] : memref<8x128xf32, #tpu.memory_space<vmem>>, vector<8x128xf32>
    tpu.vector_store %arg9[%177, %c0_46], %176 {strides = array<i32>} : memref<8x128xf32, #tpu.memory_space<vmem>>, vector<8x128xf32>,
    %c1_i32 = arith.constant 1 : i32
    %c0_47 = arith.constant 0 : index
    %c0_48 = arith.constant 0 : index
    %179 = vector.load %arg10[%c0_47, %c0_48] : memref<1x128xf32, #tpu.memory_space<vmem>>, vector<1x128xf32>
    tpu.vector_store %arg10[%c0_47, %c0_48], %175 {strides = array<i32>} : memref<1x128xf32, #tpu.memory_space<vmem>>, vector<1x128xf32>,
    %c0_49 = arith.constant 0 : index
    %c0_50 = arith.constant 0 : index
    %180 = vector.load %arg11[%c0_49, %c0_50] : memref<1x128xf32, #tpu.memory_space<vmem>>, vector<1x128xf32>
    tpu.vector_store %arg11[%c0_49, %c0_50], %173 {strides = array<i32>} : memref<1x128xf32, #tpu.memory_space<vmem>>, vector<1x128xf32>,
    %c0_51 = arith.constant 0 : index
    %c0_52 = arith.constant 0 : index
    %181 = vector.load %arg9[%c0_51, %c0_52] : memref<8x128xf32, #tpu.memory_space<vmem>>, vector<8x128xf32>
    %c0_53 = arith.constant 0 : index
    %c0_54 = arith.constant 0 : index
    %182 = vector.load %arg5[%c0_53, %c0_54] : memref<128x128xf32, #tpu.memory_space<vmem>>, vector<128x128xf32>
    %cst_55 = arith.constant dense<0.000000e+00> : vector<8x128xf32>
    %183 = tpu.matmul %181, %182, %cst_55 {dimension_numbers = #tpu.dot_dimension_numbers<[1], [0], [0], [1], [0, 0, 1, 1], [], []>} : vector<8x128xf32>, vector<128x128xf32>, vector<8x128xf32> -> vector<8x128xf32>
    %c0_56 = arith.constant 0 : index
    %c0_57 = arith.constant 0 : index
    %184 = vector.load %arg6[%c0_56, %c0_57] : memref<1x128xf32, #tpu.memory_space<vmem>>, vector<1x128xf32>
    %185 = vector.broadcast %184 : vector<1x128xf32> to vector<8x128xf32>
    %186 = arith.addf %183, %185 : vector<8x128xf32>
    %cst_58 = arith.constant 0.000000e+00 : f32
    %187 = vector.broadcast %cst_58 : f32 to vector<8x128xf32>
    %188 = arith.maximumf %186, %187 : vector<8x128xf32>
    %c0_59 = arith.constant 0 : index
    %c0_60 = arith.constant 0 : index
    %189 = vector.load %arg7[%c0_59, %c0_60] : memref<8x128xf32, #tpu.memory_space<vmem>>, vector<8x128xf32>
    tpu.vector_store %arg7[%c0_59, %c0_60], %188 {strides = array<i32>} : memref<8x128xf32, #tpu.memory_space<vmem>>, vector<8x128xf32>,
    return
  }
  func.func @transform_0(%arg0: i32) -> (i32, i32) {
    %c0_i32 = arith.constant 0 : i32
    %c0_i32_0 = arith.constant 0 : i32
    return %arg0, %c0_i32 : i32, i32
  }
  func.func @transform_1(%arg0: i32) -> (i32, i32) {
    %c0_i32 = arith.constant 0 : i32
    %c0_i32_0 = arith.constant 0 : i32
    %c0_i32_1 = arith.constant 0 : i32
    return %c0_i32, %c0_i32_0 : i32, i32
  }
  func.func @transform_2(%arg0: i32) -> (i32, i32) {
    %c0_i32 = arith.constant 0 : i32
    %c0_i32_0 = arith.constant 0 : i32
    %c0_i32_1 = arith.constant 0 : i32
    return %c0_i32, %c0_i32_0 : i32, i32
  }
  func.func @transform_3(%arg0: i32) -> (i32, i32) {
    %c0_i32 = arith.constant 0 : i32
    %c0_i32_0 = arith.constant 0 : i32
    %c0_i32_1 = arith.constant 0 : i32
    return %c0_i32, %c0_i32_0 : i32, i32
  }
  func.func @transform_4(%arg0: i32) -> (i32, i32) {
    %c0_i32 = arith.constant 0 : i32
    %c0_i32_0 = arith.constant 0 : i32
    %c0_i32_1 = arith.constant 0 : i32
    return %c0_i32, %c0_i32_0 : i32, i32
  }
  func.func @transform_5(%arg0: i32) -> (i32, i32) {
    %c0_i32 = arith.constant 0 : i32
    %c0_i32_0 = arith.constant 0 : i32
    %c0_i32_1 = arith.constant 0 : i32
    return %c0_i32, %c0_i32_0 : i32, i32
  }
  func.func @transform_6(%arg0: i32) -> (i32, i32) {
    %c0_i32 = arith.constant 0 : i32
    %c0_i32_0 = arith.constant 0 : i32
    return %arg0, %c0_i32 : i32, i32
  }
}

</mosaic_0001>

<bundles_post_ra>
// kernel: tpu_custom_call.1
= control target key start
LH: loop header
LB: loop body
LE: loop exit
PB: predicated region body
PF: predicated region fallthrough
CT: control target
= control target key end

     0   :  { %11 = vsyncpa [#allocation7], 0  ;;  %s3233_s0 = inlined_call_operand.hbm [shape: f32[8,16], index: 0, kind: input, shape index: {}]   ;;  %s3234_s1 = inlined_call_operand.hbm [shape: f32[16,512], index: 1, kind: input, shape index: {}]   ;;  %s3235_s2 = inlined_call_operand.hbm [shape: f32[128,512], index: 2, kind: input, shape index: {}]   ;;  %s3236_s3 = inlined_call_operand.vmem [shape: f32[1,512], index: 3, kind: input, shape index: {}]   ;;  %s3237_s4 = inlined_call_operand.hbm [shape: f32[128,128], index: 4, kind: input, shape index: {}]   ;;  %s3238_s5 = inlined_call_operand.vmem [shape: f32[1,128], index: 5, kind: input, shape index: {}]   ;;  %s3239_s6 = inlined_call_operand.hbm [shape: f32[8,128], index: 6, kind: output, shape index: {}]  }
   0x1   :  { %12 = vsyncpa [#allocation10], 0 }
   0x2   :  { %13 = vsyncpa [#allocation13], 0 }
   0x3   :  { %14 = vsyncpa [#allocation8], 0  ;;  %s2266_s21 = smov [#allocation9]  }
   0x4   :  { %s30_s22 = sshll.u32 %s2266_s21, 4  ;;  %s31_s22 = int_to_ptr.vmem [resolvable:$true] %s30_s22 }
   0x5   :  { %s2166_s23 = scalar_lea.vmem %s31_s22, 1024  ;;  %p2171_p1 = scmp.lt.s32.totalorder %s31_s22, %s31_s22 }
   0x6   :  { %p2167_p0 = scmp.ne.s32.totalorder %s31_s22, %s2166_s23  ;;  %p2172_p2 = scmp.lt.s32.totalorder %s2166_s23, %s2166_s23 }
   0x8   :  { %p2173_p3 = por %p2172_p2, %p2171_p1 }
   0xa   :  { %p2174_p4 = pnand %p2173_p3, %p2167_p0 }
   0xc   :  { %2177 = shalt.err (!%p2174_p4)
}
   0xd   :  { %s2267_s24 = smov 512   ;;  %s2268_s25 = smov 32  }
   0xe   :  { %36 = dma.hbm_to_vmem [thread:$0]  %s3234_s1, 1024, %s31_s22, [#allocation10], %s2267_s24, %s2267_s24, %s2268_s25  }
   0xf   :  { %s2269_s28 = smov [#allocation6]   ;;  %s2270_s30 = smov [#allocation11]  }
  0x10   :  { %s21_s29 = sshll.u32 %s2269_s28, 4  ;;  %s42_s7 = sshll.u32 %s2270_s30, 4  ;;  %s22_s29 = int_to_ptr.vmem [resolvable:$true] %s21_s29  ;;  %s43_s7 = int_to_ptr.vmem [resolvable:$true] %s42_s7 }
  0x11   :  { %s2186_s8 = scalar_lea.vmem %s22_s29, 128  ;;  %p2191_p6 = scmp.lt.s32.totalorder %s22_s29, %s22_s29 }
  0x12   :  { %p2187_p5 = scmp.ne.s32.totalorder %s22_s29, %s2186_s8  ;;  %p2192_p7 = scmp.lt.s32.totalorder %s2186_s8, %s2186_s8 }
  0x14   :  { %p2193_p8 = por %p2192_p7, %p2191_p6 }
  0x16   :  { %p2194_p9 = pnand %p2193_p8, %p2187_p5 }
  0x18   :  { %2197 = shalt.err (!%p2194_p9)
}
  0x19   :  { %24 = dma.hbm_to_vmem [thread:$0]  %s3233_s0, 128, %s22_s29, [#allocation7]  }
  0x1a   :  { %s2206_s11 = scalar_lea.vmem %s43_s7, 8192  ;;  %p2211_p11 = scmp.lt.s32.totalorder %s43_s7, %s43_s7 }
  0x1b   :  { %p2207_p10 = scmp.ne.s32.totalorder %s43_s7, %s2206_s11  ;;  %p2212_p12 = scmp.lt.s32.totalorder %s2206_s11, %s2206_s11 }
  0x1d   :  { %p2213_p13 = por %p2212_p12, %p2211_p11 }
  0x1f   :  { %p2214_p0 = pnand %p2213_p13, %p2207_p10 }
  0x21   :  { %2217 = shalt.err (!%p2214_p0)
}
  0x22   :  { %48 = dma.hbm_to_vmem [thread:$0]  %s3235_s2, 8192, %s43_s7, [#allocation10], %s2267_s24, %s2267_s24, %s2268_s25  }
  0x23   :  { %s2271_s13 = smov [#allocation12]  }
  0x24   :  { %s56_s14 = sshll.u32 %s2271_s13, 4  ;;  %s57_s14 = int_to_ptr.vmem [resolvable:$true] %s56_s14 }
  0x25   :  { %s2226_s15 = scalar_lea.vmem %s57_s14, 2048  ;;  %p2231_p2 = scmp.lt.s32.totalorder %s57_s14, %s57_s14 }
  0x26   :  { %p2227_p1 = scmp.ne.s32.totalorder %s57_s14, %s2226_s15  ;;  %p2232_p3 = scmp.lt.s32.totalorder %s2226_s15, %s2226_s15 }
  0x28   :  { %p2233_p4 = por %p2232_p3, %p2231_p2 }
  0x2a   :  { %p2234_p5 = pnand %p2233_p4, %p2227_p1 }
  0x2c   :  { %2237 = shalt.err (!%p2234_p5)
}
  0x2d   :  { %s2272_s0 = smov 128   ;;  %s2273_s16 = smov 8  }
  0x2e   :  { %62 = dma.hbm_to_vmem [thread:$0]  %s3237_s4, 2048, %s57_s14, [#allocation13], %s2272_s0, %s2272_s0, %s2273_s16  }
  0x2f   :  { %2258 = dma.done.wait [#allocation7], 128  }
  0x30   :  { %2259 = vsyncadd [#allocation7], 4294967168 }
  0x31   :  { %2260 = dma.done.wait [#allocation10], 9216  }
  0x32   :  { %2261 = vsyncadd [#allocation10], 4294958080 }
  0x33   :  { %2262 = dma.done.wait [#allocation13], 2048  }
  0x34   :  { %2263 = vsyncadd [#allocation13], 4294965248  ;;  %v3242_v0 = vmov 0.0   ;;  %v89_v1 = vld [vmem:[#allocation9 + $0x28] sm:$0xff]  ;;  %v88_v3 = vld [vmem:[#allocation9 + $0x20] sm:$0xff]  ;;  %vm114_vm0 = vcmask 130048  }
  0x35   :  { %182 = vmatprep.mubr.f32.mxu1 %v3242_v0  ;;  %81 = vst [vmem:[#allocation4] sm:$0x1] %v3242_v0  ;;  %82 = vst [vmem:[#allocation5] sm:$0x1] %v3242_v0  ;;  %401 = vmatprep.mubr.f32.mxu0 %v3242_v0  ;;  %v2328_v2 = vld [vmem:[#allocation11 + $0x1e8] sm:$0xff]  ;;  %v2331_v4 = vld [vmem:[#allocation11 + $0x1e0] sm:$0xff] }
  0x36   :  { %3336 = vst [vmem:[#allocation19_spill] sm:$0xff] %v2328_v2  ;;  %146 = vmatprep.subr.mxu1 %v89_v1  ;;  %337 = vmatprep.subr.mxu0 %v2328_v2  ;;  %v85_v5 = vld [vmem:[#allocation9 + $0x8] sm:$0xff]  ;;  %v84_v7 = vld [vmem:[#allocation9] sm:$0xff]  ;;  %v91_v9 = vld [vmem:[#allocation9 + $0x38] sm:$0xff]  ;;  %vm1746_vm1 = vcmask 1040384   ;;  %vm1748_vm2 = vcmask 1041408  }
  0x37   :  { %v2333_v6 = vld [vmem:[#allocation11 + $0x1c8] sm:$0xff]  ;;  %147 = vmatpush1.msra.mxu1 %v88_v3  ;;  %338 = vmatpush1.msra.mxu0 %v2331_v4  ;;  %v2336_v8 = vld [vmem:[#allocation11 + $0x1c0] sm:$0xff]  ;;  %v83_v11 = vld [vmem:[#allocation6] sm:$0xff]  ;;  %vm1750_vm3 = vcmask 1042432   ;;  %vm1752_vm4 = vcmask 1043456   ;;  %vm1754_vm5 = vcmask 1044480  }
  0x38   :  { %148 = vmatprep.subr.mxu1 %v85_v5  ;;  %339 = vmatprep.subr.mxu0 %v2333_v6  ;;  %v2339_v10 = vld [vmem:[#allocation11 + $0x1a8] sm:$0xff]  ;;  %v90_v12 = vld [vmem:[#allocation9 + $0x30] sm:$0xff]  ;;  %v2342_v13 = vld [vmem:[#allocation11 + $0x1a0] sm:$0xff]  ;;  %vm1756_vm6 = vcmask 1045504   ;;  %vm2275_vm7 = vmmov 0   ;;  %vm1758_vm8 = vcmask 1046528  }
  0x39   :  { %149 = vmatpush1.msra.mxu1 %v84_v7  ;;  %340 = vmatpush1.msra.mxu0 %v2336_v8  ;;  %v2344_v14 = vld [vmem:[#allocation11 + $0x188] sm:$0xff]  ;;  %v87_v15 = vld [vmem:[#allocation9 + $0x18] sm:$0xff]  ;;  %v2347_v16 = vld [vmem:[#allocation11 + $0x180] sm:$0xff]  ;;  %s2276_s20 = smov [#allocation14]  }
  0x3a   :  { %217 = vmatprep.subr.mxu1 %v91_v9  ;;  %341 = vmatprep.subr.mxu0 %v2339_v10  ;;  %v86_v17 = vld [vmem:[#allocation9 + $0x10] sm:$0xff]  ;;  %v2352_v18 = vld [vmem:[#allocation11 + $0x168] sm:$0xff]  ;;  %v2354_v19 = vld [vmem:[#allocation11 + $0x1f8] sm:$0xff]  ;;  %s1865_s21 = sshll.u32 %s2276_s20, 4  ;;  %s1866_s21 = int_to_ptr.vmem [resolvable:$true] %s1865_s21 }
  0x3b   :  { %1876 = vmatmul.mubr.msk.f32.vlgmr.msra.gmra.mxu1 %vm114_vm0, %v83_v11  ;;  %342 = vmatpush1.msra.mxu0 %v2342_v13  ;;  %3337 = vst [vmem:[#allocation20_spill] sm:$0xff] %v2354_v19  ;;  %v2357_v20 = vld [vmem:[#allocation11 + $0x160] sm:$0xff]  ;;  %v2360_v21 = vld [vmem:[#allocation11 + $0x1f0] sm:$0xff]  ;;  %v2362_v22 = vld [vmem:[#allocation11 + $0x148] sm:$0xff]  ;;  %s2238_s22 = scalar_lea.vmem %s1866_s21, 128  ;;  %p2243_p7 = scmp.lt.s32.totalorder %s1866_s21, %s1866_s21 }
  0x3c   :  { %218 = vmatpush1.msra.mxu1 %v90_v12  ;;  %343 = vmatprep.subr.mxu0 %v2344_v14  ;;  %v2366_v23 = vld [vmem:[#allocation11 + $0x1d8] sm:$0xff]  ;;  %v2368_v24 = vld [vmem:[#allocation11 + $0x140] sm:$0xff]  ;;  %v2372_v25 = vld [vmem:[#allocation11 + $0x1d0] sm:$0xff]  ;;  %p2239_p6 = scmp.ne.s32.totalorder %s1866_s21, %s2238_s22  ;;  %p2244_p8 = scmp.lt.s32.totalorder %s2238_s22, %s2238_s22 }
  0x3d   :  { %219 = vmatprep.subr.mxu1 %v87_v15  ;;  %344 = vmatpush1.msra.mxu0 %v2347_v16  ;;  %v2374_v26 = vld [vmem:[#allocation11 + $0x128] sm:$0xff]  ;;  %v2378_v27 = vld [vmem:[#allocation11 + $0x1b8] sm:$0xff]  ;;  %v2380_v28 = vld [vmem:[#allocation11 + $0x120] sm:$0xff] }
  0x3e   :  { %220 = vmatpush1.msra.mxu1 %v86_v17  ;;  %253 = vmatprep.mubr.f32.mxu1 %v3242_v0  ;;  %v2384_v29 = vld [vmem:[#allocation11 + $0x1b0] sm:$0xff]  ;;  %v2386_v30 = vld [vmem:[#allocation11 + $0x108] sm:$0xff]  ;;  %v2390_v31 = vld [vmem:[#allocation11 + $0x198] sm:$0xff]  ;;  %p2245_p9 = por %p2244_p8, %p2243_p7 }
  0x3f   :  { %345 = vmatprep.subr.mxu0 %v2352_v18  ;;  %408 = vmatprep.subr.mxu1 %v2354_v19  ;;  %v2392_v32 = vld [vmem:[#allocation11 + $0x100] sm:$0xff]  ;;  %v2396_v33 = vld [vmem:[#allocation11 + $0x190] sm:$0xff]  ;;  %v2398_v34 = vld [vmem:[#allocation11 + $0xe8] sm:$0xff] }
  0x40   :  { %1877 = vmatmul.mubr.msk.f32.vlgmr.msra.gmra.mxu1 %vm114_vm0, %v83_v11  ;;  %346 = vmatpush1.msra.mxu0 %v2357_v20  ;;  %v2402_v35 = vld [vmem:[#allocation11 + $0x178] sm:$0xff]  ;;  %v2404_v36 = vld [vmem:[#allocation11 + $0xe0] sm:$0xff]  ;;  %v2408_v37 = vld [vmem:[#allocation11 + $0x170] sm:$0xff]  ;;  %p2246_p10 = pnand %p2245_p9, %p2239_p6 }
  0x41   :  { %409 = vmatpush1.msra.mxu1 %v2360_v21  ;;  %347 = vmatprep.subr.mxu0 %v2362_v22  ;;  %v2410_v38 = vld [vmem:[#allocation11 + $0xc8] sm:$0xff]  ;;  %v2414_v39 = vld [vmem:[#allocation11 + $0x158] sm:$0xff]  ;;  %v2416_v40 = vld [vmem:[#allocation11 + $0xc0] sm:$0xff] }
  0x42   :  { %410 = vmatprep.subr.mxu1 %v2366_v23  ;;  %348 = vmatpush1.msra.mxu0 %v2368_v24  ;;  %v2420_v41 = vld [vmem:[#allocation11 + $0x150] sm:$0xff]  ;;  %v2422_v42 = vld [vmem:[#allocation11 + $0xa8] sm:$0xff]  ;;  %v2426_v43 = vld [vmem:[#allocation11 + $0x138] sm:$0xff] }
  0x43   :  { %411 = vmatpush1.msra.mxu1 %v2372_v25  ;;  %349 = vmatprep.subr.mxu0 %v2374_v26  ;;  %v2428_v44 = vld [vmem:[#allocation11 + $0xa0] sm:$0xff]  ;;  %v2432_v45 = vld [vmem:[#allocation11 + $0x130] sm:$0xff]  ;;  %v2434_v46 = vld [vmem:[#allocation11 + $0x88] sm:$0xff] }
  0x44   :  { %412 = vmatprep.subr.mxu1 %v2378_v27  ;;  %350 = vmatpush1.msra.mxu0 %v2380_v28  ;;  %3338 = vst [vmem:[#allocation21_spill] sm:$0xff] %v2434_v46  ;;  %v2438_v47 = vld [vmem:[#allocation11 + $0x118] sm:$0xff]  ;;  %v2440_v48 = vld [vmem:[#allocation11 + $0x80] sm:$0xff]  ;;  %v2444_v49 = vld [vmem:[#allocation11 + $0x110] sm:$0xff] }
  0x45   :  { %413 = vmatpush1.msra.mxu1 %v2384_v29  ;;  %351 = vmatprep.subr.mxu0 %v2386_v30  ;;  %3339 = vst [vmem:[#allocation22_spill] sm:$0xff] %v2440_v48  ;;  %v2446_v50 = vld [vmem:[#allocation11 + $0x68] sm:$0xff]  ;;  %v2450_v51 = vld [vmem:[#allocation11 + $0xf8] sm:$0xff]  ;;  %v2452_v52 = vld [vmem:[#allocation11 + $0x60] sm:$0xff] }
  0x46   :  { %414 = vmatprep.subr.mxu1 %v2390_v31  ;;  %352 = vmatpush1.msra.mxu0 %v2392_v32  ;;  %3340 = vst [vmem:[#allocation23_spill] sm:$0xff] %v2446_v50  ;;  %3341 = vst [vmem:[#allocation24_spill] sm:$0xff] %v2452_v52  ;;  %v2456_v53 = vld [vmem:[#allocation11 + $0xf0] sm:$0xff]  ;;  %v2458_v54 = vld [vmem:[#allocation11 + $0x48] sm:$0xff] }
  0x47   :  { %415 = vmatpush1.msra.mxu1 %v2396_v33  ;;  %353 = vmatprep.subr.mxu0 %v2398_v34  ;;  %3342 = vst [vmem:[#allocation25_spill] sm:$0xff] %v2458_v54  ;;  %v2462_v55 = vld [vmem:[#allocation11 + $0xd8] sm:$0xff]  ;;  %v2464_v56 = vld [vmem:[#allocation11 + $0x40] sm:$0xff]  ;;  %v2468_v57 = vld [vmem:[#allocation11 + $0xd0] sm:$0xff] }
  0x48   :  { %416 = vmatprep.subr.mxu1 %v2402_v35  ;;  %354 = vmatpush1.msra.mxu0 %v2404_v36  ;;  %3343 = vst [vmem:[#allocation26_spill] sm:$0xff] %v2464_v56  ;;  %v2470_v58 = vld [vmem:[#allocation11 + $0x28] sm:$0xff]  ;;  %v2474_v59 = vld [vmem:[#allocation11 + $0xb8] sm:$0xff]  ;;  %v2476_v60 = vld [vmem:[#allocation11 + $0x20] sm:$0xff] }
  0x49   :  { %417 = vmatpush1.msra.mxu1 %v2408_v37  ;;  %355 = vmatprep.subr.mxu0 %v2410_v38  ;;  %3344 = vst [vmem:[#allocation27_spill] sm:$0xff] %v2470_v58  ;;  %3345 = vst [vmem:[#allocation28_spill] sm:$0xff] %v2476_v60  ;;  %v2480_v61 = vld [vmem:[#allocation11 + $0xb0] sm:$0xff]  ;;  %v2482_v62 = vld [vmem:[#allocation11 + $0x8] sm:$0xff] }
  0x4a   :  { %418 = vmatprep.subr.mxu1 %v2414_v39  ;;  %356 = vmatpush1.msra.mxu0 %v2416_v40  ;;  %3346 = vst [vmem:[#allocation29_spill] sm:$0xff] %v2482_v62  ;;  %v2486_v63 = vld [vmem:[#allocation11 + $0x98] sm:$0xff]  ;;  %v2488_v1 = vld [vmem:[#allocation11] sm:$0xff]  ;;  %v2492_v3 = vld [vmem:[#allocation11 + $0x90] sm:$0xff] }
  0x4b   :  { %419 = vmatpush1.msra.mxu1 %v2420_v41  ;;  %357 = vmatprep.subr.mxu0 %v2422_v42  ;;  %3347 = vst [vmem:[#allocation30_spill] sm:$0xff] %v2486_v63  ;;  %3348 = vst [vmem:[#allocation31_spill] sm:$0xff] %v2488_v1  ;;  %v264_v5 = vld [vmem:[#allocation4] sm:$0x1]  ;;  %v2496_v7 = vld [vmem:[#allocation11 + $0x78] sm:$0xff] }
  0x4c   :  { %420 = vmatprep.subr.mxu1 %v2426_v43  ;;  %358 = vmatpush1.msra.mxu0 %v2428_v44  ;;  %3349 = vst [vmem:[#allocation32_spill] sm:$0xff] %v2492_v3  ;;  %3350 = vst [vmem:[#allocation33_spill] sm:$0xff] %v2496_v7  ;;  %v2500_v9 = vld [vmem:[#allocation11 + $0x70] sm:$0xff]  ;;  %v2503_v11 = vld [vmem:[#allocation11 + $0x58] sm:$0xff] }
  0x4d   :  { %421 = vmatpush1.msra.mxu1 %v2432_v45  ;;  %359 = vmatprep.subr.mxu0 %v2434_v46  ;;  %3351 = vst [vmem:[#allocation34_spill] sm:$0xff] %v2500_v9  ;;  %3352 = vst [vmem:[#allocation35_spill] sm:$0xff] %v2503_v11  ;;  %v2506_v12 = vld [vmem:[#allocation11 + $0x50] sm:$0xff]  ;;  %v2510_v15 = vld [vmem:[#allocation11 + $0x38] sm:$0xff] }
  0x4e   :  { %422 = vmatprep.subr.mxu1 %v2438_v47  ;;  %360 = vmatpush1.msra.mxu0 %v2440_v48  ;;  %3353 = vst [vmem:[#allocation36_spill] sm:$0xff] %v2506_v12  ;;  %3354 = vst [vmem:[#allocation37_spill] sm:$0xff] %v2510_v15  ;;  %v2514_v17 = vld [vmem:[#allocation11 + $0x30] sm:$0xff] }
  0x4f   :  { %423 = vmatpush1.msra.mxu1 %v2444_v49  ;;  %361 = vmatprep.subr.mxu0 %v2446_v50  ;;  %3355 = vst [vmem:[#allocation38_spill] sm:$0xff] %v2514_v17 }
  0x50   :  { %424 = vmatprep.subr.mxu1 %v2450_v51  ;;  %362 = vmatpush1.msra.mxu0 %v2452_v52 }
  0x51   :  { %425 = vmatpush1.msra.mxu1 %v2456_v53  ;;  %363 = vmatprep.subr.mxu0 %v2458_v54 }
  0x52   :  { %426 = vmatprep.subr.mxu1 %v2462_v55  ;;  %364 = vmatpush1.msra.mxu0 %v2464_v56 }
  0x53   :  { %427 = vmatpush1.msra.mxu1 %v2468_v57  ;;  %365 = vmatprep.subr.mxu0 %v2470_v58 }
  0x54   :  { %428 = vmatprep.subr.mxu1 %v2474_v59  ;;  %366 = vmatpush1.msra.mxu0 %v2476_v60 }
  0x55   :  { %429 = vmatpush1.msra.mxu1 %v2480_v61  ;;  %367 = vmatprep.subr.mxu0 %v2482_v62 }
  0x56   :  { %430 = vmatprep.subr.mxu1 %v2486_v63  ;;  %368 = vmatpush1.msra.mxu0 %v2488_v1  ;;  %v2518_v1 = vld [vmem:[#allocation11 + $0x18] sm:$0xff] }
  0x57   :  { %431 = vmatpush1.msra.mxu1 %v2492_v3  ;;  %402 = vmatmul.mubr.f32.vlgmr.msra.gmra.mxu0 %v264_v5  ;;  %3356 = vst [vmem:[#allocation39_spill] sm:$0xff] %v2518_v1 }
  0x58   :  { %432 = vmatprep.subr.mxu1 %v2496_v7  ;;  %472 = vmatprep.mubr.f32.mxu1 %v3242_v0  ;;  %v2522_v0 = vld [vmem:[#allocation11 + $0x10] sm:$0xff] }
  0x59   :  { %433 = vmatpush1.msra.mxu1 %v2500_v9  ;;  %515 = vmatprep.subr.mxu0 %v2328_v2  ;;  %3357 = vst [vmem:[#allocation40_spill] sm:$0xff] %v2522_v0 }
  0x5a   :  { %434 = vmatprep.subr.mxu1 %v2503_v11  ;;  %516 = vmatpush1.msra.mxu0 %v2331_v4 }
  0x5b   :  { %435 = vmatpush1.msra.mxu1 %v2506_v12  ;;  %517 = vmatprep.subr.mxu0 %v2333_v6 }
  0x5c   :  { %436 = vmatprep.subr.mxu1 %v2510_v15  ;;  %518 = vmatpush1.msra.mxu0 %v2336_v8 }
  0x5d   :  { %437 = vmatpush1.msra.mxu1 %v2514_v17  ;;  %519 = vmatprep.subr.mxu0 %v2339_v10 }
  0x5e   :  { %438 = vmatprep.subr.mxu1 %v2518_v1  ;;  %520 = vmatpush1.msra.mxu0 %v2342_v13 }
  0x5f   :  { %439 = vmatpush1.msra.mxu1 %v2522_v0  ;;  %521 = vmatprep.subr.mxu0 %v2344_v14 }
  0x60   :  { %473 = vmatmul.mubr.f32.vlgmr.msra.gmra.mxu1 %v264_v5  ;;  %586 = vmatprep.subr.mxu1 %v2354_v19  ;;  %v3358_v5 = vld [vmem:[#allocation31_spill] sm:$0xff] }
  0x61   :  { %587 = vmatpush1.msra.mxu1 %v2360_v21  ;;  %522 = vmatpush1.msra.mxu0 %v2347_v16 }
  0x62   :  { %588 = vmatprep.subr.mxu1 %v2366_v23  ;;  %523 = vmatprep.subr.mxu0 %v2352_v18 }
  0x63   :  { %589 = vmatpush1.msra.mxu1 %v2372_v25  ;;  %524 = vmatpush1.msra.mxu0 %v2357_v20 }
  0x64   :  { %590 = vmatprep.subr.mxu1 %v2378_v27  ;;  %525 = vmatprep.subr.mxu0 %v2362_v22 }
  0x65   :  { %591 = vmatpush1.msra.mxu1 %v2384_v29  ;;  %526 = vmatpush1.msra.mxu0 %v2368_v24 }
  0x66   :  { %592 = vmatprep.subr.mxu1 %v2390_v31  ;;  %527 = vmatprep.subr.mxu0 %v2374_v26 }
  0x67   :  { %593 = vmatpush1.msra.mxu1 %v2396_v33  ;;  %528 = vmatpush1.msra.mxu0 %v2380_v28 }
  0x68   :  { %594 = vmatprep.subr.mxu1 %v2402_v35  ;;  %529 = vmatprep.subr.mxu0 %v2386_v30 }
  0x69   :  { %595 = vmatpush1.msra.mxu1 %v2408_v37  ;;  %530 = vmatpush1.msra.mxu0 %v2392_v32 }
  0x6a   :  { %596 = vmatprep.subr.mxu1 %v2414_v39  ;;  %531 = vmatprep.subr.mxu0 %v2398_v34 }
  0x6b   :  { %597 = vmatpush1.msra.mxu1 %v2420_v41  ;;  %532 = vmatpush1.msra.mxu0 %v2404_v36 }
  0x6c   :  { %598 = vmatprep.subr.mxu1 %v2426_v43  ;;  %533 = vmatprep.subr.mxu0 %v2410_v38 }
  0x6d   :  { %599 = vmatpush1.msra.mxu1 %v2432_v45  ;;  %534 = vmatpush1.msra.mxu0 %v2416_v40 }
  0x6e   :  { %600 = vmatprep.subr.mxu1 %v2438_v47  ;;  %535 = vmatprep.subr.mxu0 %v2422_v42 }
  0x6f   :  { %601 = vmatpush1.msra.mxu1 %v2444_v49  ;;  %536 = vmatpush1.msra.mxu0 %v2428_v44 }
  0x70   :  { %602 = vmatprep.subr.mxu1 %v2450_v51  ;;  %537 = vmatprep.subr.mxu0 %v2434_v46 }
  0x71   :  { %603 = vmatpush1.msra.mxu1 %v2456_v53  ;;  %538 = vmatpush1.msra.mxu0 %v2440_v48 }
  0x72   :  { %604 = vmatprep.subr.mxu1 %v2462_v55  ;;  %539 = vmatprep.subr.mxu0 %v2446_v50 }
  0x73   :  { %605 = vmatpush1.msra.mxu1 %v2468_v57  ;;  %540 = vmatpush1.msra.mxu0 %v2452_v52 }
  0x74   :  { %606 = vmatprep.subr.mxu1 %v2474_v59  ;;  %541 = vmatprep.subr.mxu0 %v2458_v54  ;;  %v3359_v54 = vmov 0.0  }
  0x75   :  { %607 = vmatpush1.msra.mxu1 %v2480_v61  ;;  %542 = vmatpush1.msra.mxu0 %v2464_v56 }
  0x76   :  { %608 = vmatprep.subr.mxu1 %v2486_v63  ;;  %543 = vmatprep.subr.mxu0 %v2470_v58  ;;  %v92_v58 = vld [vmem:[%s3236_s3] sm:$0xf] }
  0x77   :  { %609 = vmatpush1.msra.mxu1 %v2492_v3  ;;  %544 = vmatpush1.msra.mxu0 %v2476_v60 }
  0x78   :  { %610 = vmatprep.subr.mxu1 %v2496_v7  ;;  %545 = vmatprep.subr.mxu0 %v2482_v62 }
  0x79   :  { %611 = vmatpush1.msra.mxu1 %v2500_v9  ;;  %546 = vmatpush1.msra.mxu0 %v3358_v5  ;;  %v94_v5 = vlaneseq }
  0x7a   :  { %612 = vmatprep.subr.mxu1 %v2503_v11  ;;  %579 = vmatprep.mubr.f32.mxu0 %v3359_v54 }
  0x7b   :  { %613 = vmatpush1.msra.mxu1 %v2506_v12  ;;  %650 = vmatprep.mubr.f32.mxu1 %v3359_v54  ;;  %v95_v62 = vshrl.u32 %v94_v5, 7 }
  0x7c   :  { %614 = vmatprep.subr.mxu1 %v2510_v15  ;;  %689 = vmatprep.subr.mxu0 %v2328_v2 }
  0x7d   :  { %615 = vmatpush1.msra.mxu1 %v2514_v17  ;;  %v96_v60 = vsub.s32 0, %v95_v62  ;;  %v100_v54 = vsub.s32 1, %v95_v62 }
  0x7e   :  { %616 = vmatprep.subr.mxu1 %v2518_v1 }
  0x7f   :  { %617 = vmatpush1.msra.mxu1 %v2522_v0  ;;  %v97_v15 = vrot.slane %v92_v58, %v96_v60  ;;  %v101_v56 = vrot.slane %v92_v58, %v100_v54  ;;  %v108_v54 = vsub.s32 3, %v95_v62 }
  0x80   :  { %760 = vmatprep.subr.mxu1 %v2354_v19  ;;  %v104_v19 = vsub.s32 2, %v95_v62 }
  0x82   :  { %v105_v3 = vrot.slane %v92_v58, %v104_v19 }
  0xfb   :  { %v184_v12 = vpop.f32.mrf.mxu1 }
  0xfc   :  { %v2595_v11 = vadd.f32 %v184_v12, %v97_v15  ;;  %v109_v15 = vrot.slane %v92_v58, %v108_v54 }
  0xfd   :  { %v186_v2 = vpop.f32.mrf.mxu1 }
  0xfe   :  { %3360 = vst [vmem:[#allocation41_spill] sm:$0xff] %v2595_v11  ;;  %v2597_v1 = vadd.f32 %v186_v2, %v101_v56 }
 0x100   :  { %v255_v5 = vpop.f32.mrf.mxu1 }
 0x101   :  { %v2601_v12 = vadd.f32 %v255_v5, %v105_v3  ;;  %v265_v3 = vld [vmem:[#allocation5] sm:$0x1] }
 0x102   :  { %v257_v48 = vpop.f32.mrf.mxu1 }
 0x117   :  { %v403_v17 = vpop.f32.mrf.mxu0 }
 0x118   :  { %v404_v0 = vadd.f32 %v403_v17, %v2595_v11  ;;  %v2604_v17 = vadd.f32 %v257_v48, %v109_v15 }
 0x119   :  { %v405_v9 = vpop.f32.mrf.mxu0 }
 0x11a   :  { %v1878_v52 = vmul.f32 -1.442695, %v404_v0  ;;  %v406_v7 = vadd.f32 %v405_v9, %v2597_v1 }
 0x11c   :  { %1966 = vpow2.f32 %v1878_v52  ;;  %v1879_v50 = vmul.f32 -1.442695, %v406_v7 }
 0x11e   :  { %1968 = vpow2.f32 %v1879_v50 }
 0x120   :  { %v474_v60 = vpop.f32.mrf.mxu1 }
 0x121   :  { %v475_v2 = vadd.f32 %v474_v60, %v2601_v12 }
 0x122   :  { %v476_v56 = vpop.f32.mrf.mxu1 }
 0x123   :  { %v1880_v11 = vmul.f32 -1.442695, %v475_v2  ;;  %v477_v0 = vadd.f32 %v476_v56, %v2604_v17  ;;  %v3362_v2 = vld [vmem:[#allocation30_spill] sm:$0xff] }
 0x124   :  { %v3363_v56 = vld [vmem:[#allocation22_spill] sm:$0xff] }
 0x125   :  { %1970 = vpow2.f32 %v1880_v11 }
 0x129   :  { %v1967_v63 = vpop.eup %1966 }
 0x12a   :  { %v488_v9 = vadd.f32 1.0, %v1967_v63 }
 0x12b   :  { %v1969_v52 = vpop.eup %1968 }
 0x12c   :  { %1972 = vrcp.f32 %v488_v9  ;;  %v489_v19 = vadd.f32 1.0, %v1969_v52  ;;  %v3365_v9 = vld [vmem:[#allocation23_spill] sm:$0xff]  ;;  %v3366_v52 = vld [vmem:[#allocation33_spill] sm:$0xff] }
 0x12d   :  { %1974 = vtanh.f32 %v477_v0  ;;  %v3364_v0 = vld [vmem:[#allocation32_spill] sm:$0xff] }
 0x12e   :  { %1976 = vrcp.f32 %v489_v19  ;;  %v3367_v19 = vld [vmem:[#allocation24_spill] sm:$0xff] }
 0x132   :  { %v1971_v50 = vpop.eup %1970 }
 0x133   :  { %v490_v5 = vadd.f32 1.0, %v1971_v50  ;;  %v3368_v50 = vld [vmem:[#allocation34_spill] sm:$0xff] }
 0x135   :  { %1978 = vrcp.f32 %v490_v5  ;;  %v3373_v5 = vld [vmem:[#allocation27_spill] sm:$0xff] }
 0x139   :  { %v1973_v62 = vpop.eup %1972 }
 0x13a   :  { %v1975_v58 = vpop.eup %1974 }
 0x13b   :  { %v1977_v7 = vpop.eup %1976  ;;  %v499_v48 = vmul.f32 %v1975_v58, %v1973_v62  ;;  %v3369_v62 = vld [vmem:[#allocation25_spill] sm:$0xff]  ;;  %v3371_v58 = vld [vmem:[#allocation26_spill] sm:$0xff] }
 0x13c   :  { %v498_v54 = vmul.f32 %v1977_v7, %v265_v3  ;;  %v3370_v3 = vld [vmem:[#allocation35_spill] sm:$0xff]  ;;  %v3372_v7 = vld [vmem:[#allocation36_spill] sm:$0xff] }
 0x13e   :  { %v2607_v60 = vadd.f32 %v499_v48, %v498_v54  ;;  %v3374_v54 = vld [vmem:[#allocation37_spill] sm:$0xff]  ;;  %v3375_v48 = vld [vmem:[#allocation28_spill] sm:$0xff] }
 0x140   :  { %1980 = vtanh.f32 %v2607_v60 }
 0x142   :  { %v1979_v63 = vpop.eup %1978 }
 0x14d   :  { %v1981_v15 = vpop.eup %1980 }
 0x14e   :  { %v2610_v11 = vmul.f32 %v1981_v15, %v1979_v63  ;;  %v3376_v63 = vld [vmem:[#allocation38_spill] sm:$0xff]  ;;  %v3377_v15 = vld [vmem:[#allocation29_spill] sm:$0xff] }
 0x150   :  { %3361 = vst [vmem:[#allocation42_spill] sm:$0xff] %v2610_v11  ;;  %580 = vmatmul.mubr.f32.vlgmr.msra.gmra.mxu0 %v2610_v11  ;;  %651 = vmatmul.mubr.f32.vlgmr.msra.gmra.mxu1 %v2610_v11  ;;  %v3378_v11 = vld [vmem:[#allocation39_spill] sm:$0xff] }
 0x151   :  { %690 = vmatpush1.msra.mxu0 %v2331_v4  ;;  %761 = vmatpush1.msra.mxu1 %v2360_v21 }
 0x152   :  { %691 = vmatprep.subr.mxu0 %v2333_v6  ;;  %762 = vmatprep.subr.mxu1 %v2366_v23 }
 0x153   :  { %692 = vmatpush1.msra.mxu0 %v2336_v8  ;;  %763 = vmatpush1.msra.mxu1 %v2372_v25 }
 0x154   :  { %693 = vmatprep.subr.mxu0 %v2339_v10  ;;  %764 = vmatprep.subr.mxu1 %v2378_v27 }
 0x155   :  { %694 = vmatpush1.msra.mxu0 %v2342_v13  ;;  %765 = vmatpush1.msra.mxu1 %v2384_v29 }
 0x156   :  { %695 = vmatprep.subr.mxu0 %v2344_v14  ;;  %766 = vmatprep.subr.mxu1 %v2390_v31 }
 0x157   :  { %696 = vmatpush1.msra.mxu0 %v2347_v16  ;;  %767 = vmatpush1.msra.mxu1 %v2396_v33 }
 0x158   :  { %697 = vmatprep.subr.mxu0 %v2352_v18  ;;  %768 = vmatprep.subr.mxu1 %v2402_v35 }
 0x159   :  { %698 = vmatpush1.msra.mxu0 %v2357_v20  ;;  %769 = vmatpush1.msra.mxu1 %v2408_v37 }
 0x15a   :  { %699 = vmatprep.subr.mxu0 %v2362_v22  ;;  %770 = vmatprep.subr.mxu1 %v2414_v39 }
 0x15b   :  { %700 = vmatpush1.msra.mxu0 %v2368_v24  ;;  %771 = vmatpush1.msra.mxu1 %v2420_v41 }
 0x15c   :  { %701 = vmatprep.subr.mxu0 %v2374_v26  ;;  %772 = vmatprep.subr.mxu1 %v2426_v43 }
 0x15d   :  { %702 = vmatpush1.msra.mxu0 %v2380_v28  ;;  %773 = vmatpush1.msra.mxu1 %v2432_v45 }
 0x15e   :  { %703 = vmatprep.subr.mxu0 %v2386_v30  ;;  %774 = vmatprep.subr.mxu1 %v2438_v47 }
 0x15f   :  { %704 = vmatpush1.msra.mxu0 %v2392_v32  ;;  %775 = vmatpush1.msra.mxu1 %v2444_v49 }
 0x160   :  { %705 = vmatprep.subr.mxu0 %v2398_v34  ;;  %776 = vmatprep.subr.mxu1 %v2450_v51 }
 0x161   :  { %706 = vmatpush1.msra.mxu0 %v2404_v36  ;;  %777 = vmatpush1.msra.mxu1 %v2456_v53 }
 0x162   :  { %707 = vmatprep.subr.mxu0 %v2410_v38  ;;  %778 = vmatprep.subr.mxu1 %v2462_v55 }
 0x163   :  { %708 = vmatpush1.msra.mxu0 %v2416_v40  ;;  %779 = vmatpush1.msra.mxu1 %v2468_v57 }
 0x164   :  { %709 = vmatprep.subr.mxu0 %v2422_v42  ;;  %780 = vmatprep.subr.mxu1 %v2474_v59 }
 0x165   :  { %710 = vmatpush1.msra.mxu0 %v2428_v44  ;;  %781 = vmatpush1.msra.mxu1 %v2480_v61 }
 0x166   :  { %711 = vmatprep.subr.mxu0 %v2434_v46  ;;  %782 = vmatprep.subr.mxu1 %v3362_v2 }
 0x167   :  { %712 = vmatpush1.msra.mxu0 %v3363_v56  ;;  %783 = vmatpush1.msra.mxu1 %v3364_v0 }
 0x168   :  { %713 = vmatprep.subr.mxu0 %v3365_v9  ;;  %784 = vmatprep.subr.mxu1 %v3366_v52 }
 0x169   :  { %714 = vmatpush1.msra.mxu0 %v3367_v19  ;;  %785 = vmatpush1.msra.mxu1 %v3368_v50  ;;  %v3379_v50 = vld [vmem:[#allocation31_spill] sm:$0xff] }
 0x16a   :  { %715 = vmatprep.subr.mxu0 %v3369_v62  ;;  %786 = vmatprep.subr.mxu1 %v3370_v3  ;;  %v3380_v62 = vmov 0.0   ;;  %v3381_v3 = vld [vmem:[#allocation40_spill] sm:$0xff] }
 0x16b   :  { %716 = vmatpush1.msra.mxu0 %v3371_v58  ;;  %787 = vmatpush1.msra.mxu1 %v3372_v7  ;;  %v3382_v7 = vld [vmem:[#allocation19_spill] sm:$0xff] }
 0x16c   :  { %717 = vmatprep.subr.mxu0 %v3373_v5  ;;  %788 = vmatprep.subr.mxu1 %v3374_v54  ;;  %v3383_v5 = vld [vmem:[#allocation20_spill] sm:$0xff]  ;;  %v3384_v54 = vld [vmem:[#allocation41_spill] sm:$0xff] }
 0x16d   :  { %718 = vmatpush1.msra.mxu0 %v3375_v48  ;;  %789 = vmatpush1.msra.mxu1 %v3376_v63  ;;  %v507_v48 = vrot.slane %v3384_v54, 1 }
 0x16e   :  { %719 = vmatprep.subr.mxu0 %v3377_v15  ;;  %790 = vmatprep.subr.mxu1 %v3378_v11  ;;  %v508_v15 = vrot.slane %v2597_v1, 1 }
 0x16f   :  { %720 = vmatpush1.msra.mxu0 %v3379_v50  ;;  %753 = vmatprep.mubr.f32.mxu0 %v3380_v62 }
 0x170   :  { %791 = vmatpush1.msra.mxu1 %v3381_v3  ;;  %824 = vmatprep.mubr.f32.mxu1 %v3380_v62  ;;  %v509_v3 = vrot.slane %v2601_v12, 1 }
 0x171   :  { %863 = vmatprep.subr.mxu0 %v3382_v7  ;;  %934 = vmatprep.subr.mxu1 %v3383_v5  ;;  %v510_v7 = vrot.slane %v2604_v17, 1 }
 0x210   :  { %v581_v58 = vpop.f32.mrf.mxu0  ;;  %v652_v9 = vpop.f32.mrf.mxu1 }
 0x211   :  { %v582_v63 = vadd.f32 %v581_v58, %v507_v48  ;;  %v653_v62 = vadd.f32 %v652_v9, %v509_v3 }
 0x212   :  { %v583_v19 = vpop.f32.mrf.mxu0  ;;  %v654_v0 = vpop.f32.mrf.mxu1 }
 0x213   :  { %v1881_v11 = vmul.f32 -1.442695, %v582_v63  ;;  %v584_v52 = vadd.f32 %v583_v19, %v508_v15  ;;  %v1883_v5 = vmul.f32 -1.442695, %v653_v62  ;;  %v655_v56 = vadd.f32 %v654_v0, %v510_v7 }
 0x215   :  { %1982 = vpow2.f32 %v1881_v11  ;;  %v1882_v50 = vmul.f32 -1.442695, %v584_v52 }
 0x217   :  { %1984 = vpow2.f32 %v1882_v50 }
 0x218   :  { %1986 = vpow2.f32 %v1883_v5  ;;  %v3388_v5 = vld [vmem:[#allocation23_spill] sm:$0xff] }
 0x219   :  { %1988 = vtanh.f32 %v655_v56  ;;  %v3387_v56 = vld [vmem:[#allocation32_spill] sm:$0xff] }
 0x222   :  { %v1983_v54 = vpop.eup %1982 }
 0x223   :  { %v666_v2 = vadd.f32 1.0, %v1983_v54  ;;  %v3389_v54 = vld [vmem:[#allocation33_spill] sm:$0xff] }
 0x224   :  { %v1985_v58 = vpop.eup %1984 }
 0x225   :  { %1990 = vrcp.f32 %v666_v2  ;;  %v667_v48 = vadd.f32 1.0, %v1985_v58  ;;  %v1987_v11 = vpop.eup %1986  ;;  %v3386_v2 = vld [vmem:[#allocation22_spill] sm:$0xff]  ;;  %v3390_v58 = vld [vmem:[#allocation24_spill] sm:$0xff] }
 0x226   :  { %v1989_v52 = vpop.eup %1988  ;;  %v668_v15 = vadd.f32 1.0, %v1987_v11  ;;  %v3392_v11 = vld [vmem:[#allocation25_spill] sm:$0xff] }
 0x227   :  { %1992 = vrcp.f32 %v667_v48  ;;  %v3391_v48 = vld [vmem:[#allocation34_spill] sm:$0xff] }
 0x228   :  { %1994 = vrcp.f32 %v668_v15  ;;  %v3397_v15 = vld [vmem:[#allocation37_spill] sm:$0xff] }
 0x232   :  { %v1991_v19 = vpop.eup %1990 }
 0x233   :  { %v677_v50 = vmul.f32 %v1991_v19, %v1989_v52  ;;  %v3393_v52 = vld [vmem:[#allocation35_spill] sm:$0xff]  ;;  %v3394_v19 = vld [vmem:[#allocation26_spill] sm:$0xff] }
 0x234   :  { %v1993_v63 = vpop.eup %1992 }
 0x235   :  { %v676_v9 = vmul.f32 %v1993_v63, %v2607_v60  ;;  %v1995_v0 = vpop.eup %1994  ;;  %v3385_v60 = vld [vmem:[#allocation30_spill] sm:$0xff]  ;;  %v3396_v63 = vld [vmem:[#allocation27_spill] sm:$0xff] }
 0x237   :  { %v2685_v3 = vadd.f32 %v677_v50, %v676_v9  ;;  %v3395_v50 = vld [vmem:[#allocation36_spill] sm:$0xff] }
 0x238   :  { %v3398_v9 = vld [vmem:[#allocation28_spill] sm:$0xff] }
 0x239   :  { %1996 = vtanh.f32 %v2685_v3 }
 0x246   :  { %v1997_v62 = vpop.eup %1996 }
 0x247   :  { %v2688_v7 = vmul.f32 %v1997_v62, %v1995_v0  ;;  %v3399_v0 = vld [vmem:[#allocation38_spill] sm:$0xff]  ;;  %v3400_v62 = vld [vmem:[#allocation29_spill] sm:$0xff] }
 0x249   :  { %754 = vmatmul.mubr.f32.vlgmr.msra.gmra.mxu0 %v2688_v7  ;;  %825 = vmatmul.mubr.f32.vlgmr.msra.gmra.mxu1 %v2688_v7 }
 0x24a   :  { %864 = vmatpush1.msra.mxu0 %v2331_v4  ;;  %935 = vmatpush1.msra.mxu1 %v2360_v21 }
 0x24b   :  { %865 = vmatprep.subr.mxu0 %v2333_v6  ;;  %936 = vmatprep.subr.mxu1 %v2366_v23 }
 0x24c   :  { %866 = vmatpush1.msra.mxu0 %v2336_v8  ;;  %937 = vmatpush1.msra.mxu1 %v2372_v25 }
 0x24d   :  { %867 = vmatprep.subr.mxu0 %v2339_v10  ;;  %938 = vmatprep.subr.mxu1 %v2378_v27 }
 0x24e   :  { %868 = vmatpush1.msra.mxu0 %v2342_v13  ;;  %939 = vmatpush1.msra.mxu1 %v2384_v29 }
 0x24f   :  { %869 = vmatprep.subr.mxu0 %v2344_v14  ;;  %940 = vmatprep.subr.mxu1 %v2390_v31 }
 0x250   :  { %870 = vmatpush1.msra.mxu0 %v2347_v16  ;;  %941 = vmatpush1.msra.mxu1 %v2396_v33 }
 0x251   :  { %871 = vmatprep.subr.mxu0 %v2352_v18  ;;  %942 = vmatprep.subr.mxu1 %v2402_v35 }
 0x252   :  { %872 = vmatpush1.msra.mxu0 %v2357_v20  ;;  %943 = vmatpush1.msra.mxu1 %v2408_v37 }
 0x253   :  { %873 = vmatprep.subr.mxu0 %v2362_v22  ;;  %944 = vmatprep.subr.mxu1 %v2414_v39 }
 0x254   :  { %874 = vmatpush1.msra.mxu0 %v2368_v24  ;;  %945 = vmatpush1.msra.mxu1 %v2420_v41 }
 0x255   :  { %875 = vmatprep.subr.mxu0 %v2374_v26  ;;  %946 = vmatprep.subr.mxu1 %v2426_v43 }
 0x256   :  { %876 = vmatpush1.msra.mxu0 %v2380_v28  ;;  %947 = vmatpush1.msra.mxu1 %v2432_v45 }
 0x257   :  { %877 = vmatprep.subr.mxu0 %v2386_v30  ;;  %948 = vmatprep.subr.mxu1 %v2438_v47 }
 0x258   :  { %878 = vmatpush1.msra.mxu0 %v2392_v32  ;;  %949 = vmatpush1.msra.mxu1 %v2444_v49 }
 0x259   :  { %879 = vmatprep.subr.mxu0 %v2398_v34  ;;  %950 = vmatprep.subr.mxu1 %v2450_v51 }
 0x25a   :  { %880 = vmatpush1.msra.mxu0 %v2404_v36  ;;  %951 = vmatpush1.msra.mxu1 %v2456_v53 }
 0x25b   :  { %881 = vmatprep.subr.mxu0 %v2410_v38  ;;  %952 = vmatprep.subr.mxu1 %v2462_v55 }
 0x25c   :  { %882 = vmatpush1.msra.mxu0 %v2416_v40  ;;  %953 = vmatpush1.msra.mxu1 %v2468_v57 }
 0x25d   :  { %883 = vmatprep.subr.mxu0 %v2422_v42  ;;  %954 = vmatprep.subr.mxu1 %v2474_v59 }
 0x25e   :  { %884 = vmatpush1.msra.mxu0 %v2428_v44  ;;  %955 = vmatpush1.msra.mxu1 %v2480_v61 }
 0x25f   :  { %885 = vmatprep.subr.mxu0 %v2434_v46  ;;  %956 = vmatprep.subr.mxu1 %v3385_v60 }
 0x260   :  { %886 = vmatpush1.msra.mxu0 %v3386_v2  ;;  %957 = vmatpush1.msra.mxu1 %v3387_v56 }
 0x261   :  { %887 = vmatprep.subr.mxu0 %v3388_v5  ;;  %958 = vmatprep.subr.mxu1 %v3389_v54 }
 0x262   :  { %888 = vmatpush1.msra.mxu0 %v3390_v58  ;;  %959 = vmatpush1.msra.mxu1 %v3391_v48  ;;  %v3401_v58 = vld [vmem:[#allocation39_spill] sm:$0xff] }
 0x263   :  { %889 = vmatprep.subr.mxu0 %v3392_v11  ;;  %960 = vmatprep.subr.mxu1 %v3393_v52  ;;  %v3402_v48 = vld [vmem:[#allocation31_spill] sm:$0xff]  ;;  %v3403_v11 = vmov 0.0   ;;  %v3404_v52 = vld [vmem:[#allocation40_spill] sm:$0xff] }
 0x264   :  { %890 = vmatpush1.msra.mxu0 %v3394_v19  ;;  %961 = vmatpush1.msra.mxu1 %v3395_v50  ;;  %v3405_v50 = vld [vmem:[#allocation19_spill] sm:$0xff] }
 0x265   :  { %891 = vmatprep.subr.mxu0 %v3396_v63  ;;  %962 = vmatprep.subr.mxu1 %v3397_v15  ;;  %v3406_v63 = vld [vmem:[#allocation20_spill] sm:$0xff]  ;;  %v3407_v15 = vld [vmem:[#allocation41_spill] sm:$0xff] }
 0x266   :  { %892 = vmatpush1.msra.mxu0 %v3398_v9  ;;  %963 = vmatpush1.msra.mxu1 %v3399_v0  ;;  %v681_v9 = vrot.slane %v3407_v15, 2 }
 0x267   :  { %893 = vmatprep.subr.mxu0 %v3400_v62  ;;  %964 = vmatprep.subr.mxu1 %v3401_v58  ;;  %v682_v62 = vrot.slane %v2597_v1, 2 }
 0x268   :  { %894 = vmatpush1.msra.mxu0 %v3402_v48  ;;  %927 = vmatprep.mubr.f32.mxu0 %v3403_v11 }
 0x269   :  { %965 = vmatpush1.msra.mxu1 %v3404_v52  ;;  %998 = vmatprep.mubr.f32.mxu1 %v3403_v11  ;;  %v683_v52 = vrot.slane %v2601_v12, 2 }
 0x26a   :  { %1037 = vmatprep.subr.mxu0 %v3405_v50  ;;  %1108 = vmatprep.subr.mxu1 %v3406_v63  ;;  %v684_v50 = vrot.slane %v2604_v17, 2 }
 0x309   :  { %v755_v19 = vpop.f32.mrf.mxu0  ;;  %v826_v56 = vpop.f32.mrf.mxu1 }
 0x30a   :  { %v756_v0 = vadd.f32 %v755_v19, %v681_v9  ;;  %v827_v11 = vadd.f32 %v826_v56, %v683_v52 }
 0x30b   :  { %v757_v54 = vpop.f32.mrf.mxu0  ;;  %v828_v2 = vpop.f32.mrf.mxu1 }
 0x30c   :  { %v1884_v58 = vmul.f32 -1.442695, %v756_v0  ;;  %v758_v5 = vadd.f32 %v757_v54, %v682_v62  ;;  %v1886_v63 = vmul.f32 -1.442695, %v827_v11  ;;  %v829_v60 = vadd.f32 %v828_v2, %v684_v50  ;;  %v3408_v50 = vld [vmem:[#allocation42_spill] sm:$0xff] }
 0x30e   :  { %1998 = vpow2.f32 %v1884_v58  ;;  %v1885_v48 = vmul.f32 -1.442695, %v758_v5 }
 0x310   :  { %2000 = vpow2.f32 %v1885_v48 }
 0x311   :  { %2002 = vpow2.f32 %v1886_v63 }
 0x312   :  { %2004 = vtanh.f32 %v829_v60  ;;  %v1726_v60 = vrot.slane %v2688_v7, 7 }
 0x314   :  { %v1747_v63 = vsel %vm1746_vm1, %v3408_v50, %v1726_v60  ;;  %v2857_v50 = vld [vmem:[#allocation11 + $0x1d8] sm:$0xff] }
 0x31b   :  { %v1999_v15 = vpop.eup %1998 }
 0x31c   :  { %v840_v46 = vadd.f32 1.0, %v1999_v15 }
 0x31d   :  { %v2001_v19 = vpop.eup %2000 }
 0x31e   :  { %2006 = vrcp.f32 %v840_v46  ;;  %v841_v9 = vadd.f32 1.0, %v2001_v19  ;;  %v2003_v54 = vpop.eup %2002 }
 0x31f   :  { %v2005_v5 = vpop.eup %2004  ;;  %v842_v62 = vadd.f32 1.0, %v2003_v54 }
 0x320   :  { %2008 = vrcp.f32 %v841_v9 }
 0x321   :  { %2010 = vrcp.f32 %v842_v62 }
 0x32b   :  { %v2007_v58 = vpop.eup %2006 }
 0x32c   :  { %v851_v48 = vmul.f32 %v2007_v58, %v2005_v5 }
 0x32d   :  { %v2009_v0 = vpop.eup %2008 }
 0x32e   :  { %v850_v56 = vmul.f32 %v2009_v0, %v2685_v3  ;;  %v2011_v2 = vpop.eup %2010 }
 0x330   :  { %v2763_v52 = vadd.f32 %v851_v48, %v850_v56 }
 0x332   :  { %2012 = vtanh.f32 %v2763_v52 }
 0x33f   :  { %v2013_v11 = vpop.eup %2012 }
 0x340   :  { %v854_v46 = vmul.f32 %v2013_v11, %v2011_v2 }
 0x342   :  { %928 = vmatmul.mubr.f32.vlgmr.msra.gmra.mxu0 %v854_v46  ;;  %v1729_v15 = vrot.slane %v854_v46, 6  ;;  %999 = vmatmul.mubr.f32.vlgmr.msra.gmra.mxu1 %v854_v46  ;;  %v2848_v46 = vld [vmem:[#allocation11 + $0x1e0] sm:$0xff] }
 0x343   :  { %1038 = vmatpush1.msra.mxu0 %v2331_v4  ;;  %1109 = vmatpush1.msra.mxu1 %v2360_v21  ;;  %v3409_v4 = vld [vmem:[#allocation21_spill] sm:$0xff]  ;;  %v3418_v21 = vld [vmem:[#allocation35_spill] sm:$0xff] }
 0x344   :  { %1039 = vmatprep.subr.mxu0 %v2333_v6  ;;  %1110 = vmatprep.subr.mxu1 %v2366_v23  ;;  %v2772_v3 = vsel %vm1748_vm2, %v1747_v63, %v1729_v15  ;;  %v3410_v6 = vld [vmem:[#allocation30_spill] sm:$0xff]  ;;  %v3420_v23 = vld [vmem:[#allocation36_spill] sm:$0xff] }
 0x345   :  { %1040 = vmatpush1.msra.mxu0 %v2336_v8  ;;  %1111 = vmatpush1.msra.mxu1 %v2372_v25  ;;  %v3411_v8 = vld [vmem:[#allocation22_spill] sm:$0xff]  ;;  %v3422_v25 = vld [vmem:[#allocation37_spill] sm:$0xff]  ;;  %v2851_v15 = vld [vmem:[#allocation11 + $0x1f0] sm:$0xff] }
 0x346   :  { %1041 = vmatprep.subr.mxu0 %v2339_v10  ;;  %1112 = vmatprep.subr.mxu1 %v2378_v27  ;;  %v3412_v10 = vld [vmem:[#allocation32_spill] sm:$0xff]  ;;  %v3424_v27 = vld [vmem:[#allocation38_spill] sm:$0xff] }
 0x347   :  { %1042 = vmatpush1.msra.mxu0 %v2342_v13  ;;  %1113 = vmatpush1.msra.mxu1 %v2384_v29  ;;  %v3413_v13 = vld [vmem:[#allocation23_spill] sm:$0xff] }
 0x348   :  { %1043 = vmatprep.subr.mxu0 %v2344_v14  ;;  %1114 = vmatprep.subr.mxu1 %v2390_v31  ;;  %v3414_v14 = vld [vmem:[#allocation33_spill] sm:$0xff]  ;;  %v3426_v29 = vld [vmem:[#allocation39_spill] sm:$0xff]  ;;  %v3428_v31 = vmov 0.0  }
 0x349   :  { %1044 = vmatpush1.msra.mxu0 %v2347_v16  ;;  %1115 = vmatpush1.msra.mxu1 %v2396_v33  ;;  %v3415_v16 = vld [vmem:[#allocation24_spill] sm:$0xff]  ;;  %v2834_v33 = vld [vmem:[#allocation11 + $0x1e8] sm:$0xff] }
 0x34a   :  { %1045 = vmatprep.subr.mxu0 %v2352_v18  ;;  %1116 = vmatprep.subr.mxu1 %v2402_v35  ;;  %v3416_v18 = vld [vmem:[#allocation34_spill] sm:$0xff]  ;;  %3430 = vst [vmem:[#allocation19_spill] sm:$0xff] %v2834_v33  ;;  %v3432_v35 = vld [vmem:[#allocation41_spill] sm:$0xff] }
 0x34b   :  { %1046 = vmatpush1.msra.mxu0 %v2357_v20  ;;  %1117 = vmatpush1.msra.mxu1 %v2408_v37  ;;  %v3417_v20 = vld [vmem:[#allocation25_spill] sm:$0xff] }
 0x34c   :  { %1047 = vmatprep.subr.mxu0 %v2362_v22  ;;  %1118 = vmatprep.subr.mxu1 %v2414_v39  ;;  %v3419_v22 = vld [vmem:[#allocation26_spill] sm:$0xff]  ;;  %v856_v39 = vrot.slane %v2597_v1, 3 }
 0x34d   :  { %1048 = vmatpush1.msra.mxu0 %v2368_v24  ;;  %1119 = vmatpush1.msra.mxu1 %v2420_v41  ;;  %v3421_v24 = vld [vmem:[#allocation27_spill] sm:$0xff] }
 0x34e   :  { %1049 = vmatprep.subr.mxu0 %v2374_v26  ;;  %1120 = vmatprep.subr.mxu1 %v2426_v43  ;;  %v3423_v26 = vld [vmem:[#allocation28_spill] sm:$0xff] }
 0x34f   :  { %1050 = vmatpush1.msra.mxu0 %v2380_v28  ;;  %1121 = vmatpush1.msra.mxu1 %v2432_v45  ;;  %v3425_v28 = vld [vmem:[#allocation29_spill] sm:$0xff]  ;;  %v857_v45 = vrot.slane %v2601_v12, 3 }
 0x350   :  { %1051 = vmatprep.subr.mxu0 %v2386_v30  ;;  %1122 = vmatprep.subr.mxu1 %v2438_v47  ;;  %v3427_v30 = vld [vmem:[#allocation31_spill] sm:$0xff] }
 0x351   :  { %1052 = vmatpush1.msra.mxu0 %v2392_v32  ;;  %1123 = vmatpush1.msra.mxu1 %v2444_v49  ;;  %v3429_v32 = vld [vmem:[#allocation40_spill] sm:$0xff] }
 0x352   :  { %1053 = vmatprep.subr.mxu0 %v2398_v34  ;;  %1124 = vmatprep.subr.mxu1 %v2450_v51  ;;  %v2837_v34 = vld [vmem:[#allocation11 + $0x1f8] sm:$0xff]  ;;  %v858_v51 = vrot.slane %v2604_v17, 3 }
 0x353   :  { %1054 = vmatpush1.msra.mxu0 %v2404_v36  ;;  %1125 = vmatpush1.msra.mxu1 %v2456_v53  ;;  %3431 = vst [vmem:[#allocation20_spill] sm:$0xff] %v2837_v34  ;;  %v855_v36 = vrot.slane %v3432_v35, 3 }
 0x354   :  { %1055 = vmatprep.subr.mxu0 %v2410_v38  ;;  %1126 = vmatprep.subr.mxu1 %v2462_v55 }
 0x355   :  { %1056 = vmatpush1.msra.mxu0 %v2416_v40  ;;  %1127 = vmatpush1.msra.mxu1 %v2468_v57 }
 0x356   :  { %1057 = vmatprep.subr.mxu0 %v2422_v42  ;;  %1128 = vmatprep.subr.mxu1 %v2474_v59 }
 0x357   :  { %1058 = vmatpush1.msra.mxu0 %v2428_v44  ;;  %1129 = vmatpush1.msra.mxu1 %v2480_v61 }
 0x358   :  { %1059 = vmatprep.subr.mxu0 %v3409_v4  ;;  %1130 = vmatprep.subr.mxu1 %v3410_v6  ;;  %v2863_v4 = vld [vmem:[#allocation11 + $0x1c0] sm:$0xff]  ;;  %v2866_v6 = vld [vmem:[#allocation11 + $0x1d0] sm:$0xff] }
 0x359   :  { %1060 = vmatpush1.msra.mxu0 %v3411_v8  ;;  %1131 = vmatpush1.msra.mxu1 %v3412_v10  ;;  %v2869_v8 = vld [vmem:[#allocation11 + $0x1a8] sm:$0xff]  ;;  %v2872_v10 = vld [vmem:[#allocation11 + $0x1b8] sm:$0xff] }
 0x35a   :  { %1061 = vmatprep.subr.mxu0 %v3413_v13  ;;  %1132 = vmatprep.subr.mxu1 %v3414_v14  ;;  %v2875_v13 = vld [vmem:[#allocation11 + $0x1a0] sm:$0xff]  ;;  %v2881_v14 = vld [vmem:[#allocation11 + $0x188] sm:$0xff] }
 0x35b   :  { %1062 = vmatpush1.msra.mxu0 %v3415_v16  ;;  %1133 = vmatpush1.msra.mxu1 %v3416_v18  ;;  %v2884_v16 = vld [vmem:[#allocation11 + $0x198] sm:$0xff]  ;;  %v2887_v18 = vld [vmem:[#allocation11 + $0x180] sm:$0xff] }
 0x35c   :  { %1063 = vmatprep.subr.mxu0 %v3417_v20  ;;  %1134 = vmatprep.subr.mxu1 %v3418_v21  ;;  %v2890_v20 = vld [vmem:[#allocation11 + $0x190] sm:$0xff]  ;;  %v2893_v21 = vld [vmem:[#allocation11 + $0x168] sm:$0xff] }
 0x35d   :  { %1064 = vmatpush1.msra.mxu0 %v3419_v22  ;;  %1135 = vmatpush1.msra.mxu1 %v3420_v23  ;;  %v2896_v22 = vld [vmem:[#allocation11 + $0x178] sm:$0xff]  ;;  %v2899_v23 = vld [vmem:[#allocation11 + $0x160] sm:$0xff] }
 0x35e   :  { %1065 = vmatprep.subr.mxu0 %v3421_v24  ;;  %1136 = vmatprep.subr.mxu1 %v3422_v25  ;;  %v2902_v24 = vld [vmem:[#allocation11 + $0x170] sm:$0xff]  ;;  %v2905_v25 = vld [vmem:[#allocation11 + $0x148] sm:$0xff] }
 0x35f   :  { %1066 = vmatpush1.msra.mxu0 %v3423_v26  ;;  %1137 = vmatpush1.msra.mxu1 %v3424_v27  ;;  %v2908_v26 = vld [vmem:[#allocation11 + $0x158] sm:$0xff]  ;;  %v2911_v27 = vld [vmem:[#allocation11 + $0x140] sm:$0xff] }
 0x360   :  { %1067 = vmatprep.subr.mxu0 %v3425_v28  ;;  %1138 = vmatprep.subr.mxu1 %v3426_v29  ;;  %v2914_v28 = vld [vmem:[#allocation11 + $0x150] sm:$0xff]  ;;  %v2917_v29 = vld [vmem:[#allocation11 + $0x128] sm:$0xff] }
 0x361   :  { %1068 = vmatpush1.msra.mxu0 %v3427_v30  ;;  %1101 = vmatprep.mubr.f32.mxu0 %v3428_v31  ;;  %v2920_v30 = vld [vmem:[#allocation11 + $0x138] sm:$0xff] }
 0x362   :  { %1139 = vmatpush1.msra.mxu1 %v3429_v32  ;;  %1172 = vmatprep.mubr.f32.mxu1 %v3428_v31  ;;  %v2923_v32 = vld [vmem:[#allocation11 + $0x120] sm:$0xff] }
 0x363   :  { %1211 = vmatprep.subr.mxu0 %v2834_v33  ;;  %1282 = vmatprep.subr.mxu1 %v2837_v34 }
 0x402   :  { %v929_v37 = vpop.f32.mrf.mxu0  ;;  %v1000_v44 = vpop.f32.mrf.mxu1 }
 0x403   :  { %v930_v38 = vadd.f32 %v929_v37, %v855_v36  ;;  %v1001_v47 = vadd.f32 %v1000_v44, %v857_v45  ;;  %v2926_v36 = vld [vmem:[#allocation11 + $0x130] sm:$0xff]  ;;  %v2929_v37 = vld [vmem:[#allocation11 + $0x108] sm:$0xff] }
 0x404   :  { %v931_v40 = vpop.f32.mrf.mxu0  ;;  %v1002_v49 = vpop.f32.mrf.mxu1  ;;  %v2950_v44 = vld [vmem:[#allocation11 + $0xf0] sm:$0xff]  ;;  %v2953_v45 = vld [vmem:[#allocation11 + $0xc8] sm:$0xff] }
 0x405   :  { %v1887_v41 = vmul.f32 -1.442695, %v930_v38  ;;  %v932_v42 = vadd.f32 %v931_v40, %v856_v39  ;;  %v1889_v53 = vmul.f32 -1.442695, %v1001_v47  ;;  %v1003_v55 = vadd.f32 %v1002_v49, %v858_v51  ;;  %v2932_v38 = vld [vmem:[#allocation11 + $0x118] sm:$0xff]  ;;  %v2935_v39 = vld [vmem:[#allocation11 + $0x100] sm:$0xff] }
 0x406   :  { %v2938_v40 = vld [vmem:[#allocation11 + $0x110] sm:$0xff]  ;;  %v2956_v47 = vld [vmem:[#allocation11 + $0xd8] sm:$0xff]  ;;  %v2959_v49 = vld [vmem:[#allocation11 + $0xc0] sm:$0xff] }
 0x407   :  { %2014 = vpow2.f32 %v1887_v41  ;;  %v1888_v43 = vmul.f32 -1.442695, %v932_v42  ;;  %v2941_v41 = vld [vmem:[#allocation11 + $0xe8] sm:$0xff]  ;;  %v2944_v42 = vld [vmem:[#allocation11 + $0xf8] sm:$0xff]  ;;  %v2962_v51 = vld [vmem:[#allocation11 + $0xd0] sm:$0xff] }
 0x409   :  { %2016 = vpow2.f32 %v1888_v43  ;;  %v2947_v43 = vld [vmem:[#allocation11 + $0xe0] sm:$0xff] }
 0x40a   :  { %2018 = vpow2.f32 %v1889_v53  ;;  %v2965_v53 = vld [vmem:[#allocation11 + $0xa8] sm:$0xff] }
 0x40b   :  { %2020 = vtanh.f32 %v1003_v55  ;;  %v2968_v55 = vld [vmem:[#allocation11 + $0xb8] sm:$0xff] }
 0x414   :  { %v2015_v57 = vpop.eup %2014 }
 0x415   :  { %v1014_v59 = vadd.f32 1.0, %v2015_v57  ;;  %v2971_v57 = vld [vmem:[#allocation11 + $0xa0] sm:$0xff] }
 0x416   :  { %v2017_v61 = vpop.eup %2016 }
 0x417   :  { %2022 = vrcp.f32 %v1014_v59  ;;  %v1015_v7 = vadd.f32 1.0, %v2017_v61  ;;  %v2019_v19 = vpop.eup %2018  ;;  %v2974_v59 = vld [vmem:[#allocation11 + $0xb0] sm:$0xff]  ;;  %v2977_v61 = vld [vmem:[#allocation11 + $0x88] sm:$0xff] }
 0x418   :  { %v2021_v9 = vpop.eup %2020  ;;  %v1016_v48 = vadd.f32 1.0, %v2019_v19  ;;  %3433 = vst [vmem:[#allocation42_spill] sm:$0xff] %v2977_v61  ;;  %v2983_v19 = vld [vmem:[#allocation11 + $0x80] sm:$0xff] }
 0x419   :  { %2024 = vrcp.f32 %v1015_v7  ;;  %v2980_v7 = vld [vmem:[#allocation11 + $0x98] sm:$0xff]  ;;  %3435 = vst [vmem:[#allocation30_spill] sm:$0xff] %v2983_v19 }
 0x41a   :  { %2026 = vrcp.f32 %v1016_v48  ;;  %3434 = vst [vmem:[#allocation21_spill] sm:$0xff] %v2980_v7  ;;  %v2998_v48 = vld [vmem:[#allocation11 + $0x70] sm:$0xff] }
 0x41b   :  { %3440 = vst [vmem:[#allocation24_spill] sm:$0xff] %v2998_v48 }
 0x424   :  { %v2023_v54 = vpop.eup %2022 }
 0x425   :  { %v1025_v5 = vmul.f32 %v2023_v54, %v2021_v9  ;;  %v2986_v9 = vld [vmem:[#allocation11 + $0x90] sm:$0xff]  ;;  %v2989_v54 = vld [vmem:[#allocation11 + $0x68] sm:$0xff] }
 0x426   :  { %v2025_v58 = vpop.eup %2024  ;;  %3436 = vst [vmem:[#allocation22_spill] sm:$0xff] %v2986_v9  ;;  %3437 = vst [vmem:[#allocation32_spill] sm:$0xff] %v2989_v54 }
 0x427   :  { %v1024_v0 = vmul.f32 %v2025_v58, %v2763_v52  ;;  %v2027_v56 = vpop.eup %2026  ;;  %v2854_v52 = vld [vmem:[#allocation11 + $0x1c8] sm:$0xff]  ;;  %v2995_v58 = vld [vmem:[#allocation11 + $0x60] sm:$0xff] }
 0x428   :  { %3439 = vst [vmem:[#allocation33_spill] sm:$0xff] %v2995_v58 }
 0x429   :  { %v2845_v62 = vadd.f32 %v1025_v5, %v1024_v0  ;;  %v2992_v5 = vld [vmem:[#allocation11 + $0x78] sm:$0xff]  ;;  %v3001_v0 = vld [vmem:[#allocation11 + $0x48] sm:$0xff] }
 0x42a   :  { %3438 = vst [vmem:[#allocation23_spill] sm:$0xff] %v2992_v5  ;;  %3441 = vst [vmem:[#allocation34_spill] sm:$0xff] %v3001_v0 }
 0x42b   :  { %2028 = vtanh.f32 %v2845_v62 }
 0x438   :  { %v2029_v2 = vpop.eup %2028 }
 0x439   :  { %v1028_v11 = vmul.f32 %v2029_v2, %v2027_v56  ;;  %v3004_v56 = vld [vmem:[#allocation11 + $0x58] sm:$0xff]  ;;  %v3007_v2 = vld [vmem:[#allocation11 + $0x40] sm:$0xff] }
 0x43a   :  { %3442 = vst [vmem:[#allocation25_spill] sm:$0xff] %v3004_v56  ;;  %3443 = vst [vmem:[#allocation35_spill] sm:$0xff] %v3007_v2 }
 0x43b   :  { %1102 = vmatmul.mubr.f32.vlgmr.msra.gmra.mxu0 %v1028_v11  ;;  %v1732_v60 = vrot.slane %v1028_v11, 5  ;;  %1173 = vmatmul.mubr.f32.vlgmr.msra.gmra.mxu1 %v1028_v11  ;;  %v3010_v11 = vld [vmem:[#allocation11 + $0x50] sm:$0xff] }
 0x43c   :  { %1212 = vmatpush1.msra.mxu0 %v2848_v46  ;;  %1283 = vmatpush1.msra.mxu1 %v2851_v15  ;;  %3444 = vst [vmem:[#allocation26_spill] sm:$0xff] %v3010_v11 }
 0x43d   :  { %1213 = vmatprep.subr.mxu0 %v2854_v52  ;;  %1284 = vmatprep.subr.mxu1 %v2857_v50  ;;  %v2861_v63 = vsel %vm1750_vm3, %v2772_v3, %v1732_v60  ;;  %v2878_v3 = vld [vmem:[#allocation11 + $0x1b0] sm:$0xff]  ;;  %v3013_v60 = vld [vmem:[#allocation11 + $0x28] sm:$0xff] }
 0x43e   :  { %1214 = vmatpush1.msra.mxu0 %v2863_v4  ;;  %1285 = vmatpush1.msra.mxu1 %v2866_v6  ;;  %3445 = vst [vmem:[#allocation36_spill] sm:$0xff] %v3013_v60 }
 0x43f   :  { %1215 = vmatprep.subr.mxu0 %v2869_v8  ;;  %1286 = vmatprep.subr.mxu1 %v2872_v10 }
 0x440   :  { %1216 = vmatpush1.msra.mxu0 %v2875_v13  ;;  %1287 = vmatpush1.msra.mxu1 %v2878_v3 }
 0x441   :  { %1217 = vmatprep.subr.mxu0 %v2881_v14  ;;  %1288 = vmatprep.subr.mxu1 %v2884_v16 }
 0x442   :  { %1218 = vmatpush1.msra.mxu0 %v2887_v18  ;;  %1289 = vmatpush1.msra.mxu1 %v2890_v20 }
 0x443   :  { %1219 = vmatprep.subr.mxu0 %v2893_v21  ;;  %1290 = vmatprep.subr.mxu1 %v2896_v22 }
 0x444   :  { %1220 = vmatpush1.msra.mxu0 %v2899_v23  ;;  %1291 = vmatpush1.msra.mxu1 %v2902_v24 }
 0x445   :  { %1221 = vmatprep.subr.mxu0 %v2905_v25  ;;  %1292 = vmatprep.subr.mxu1 %v2908_v26 }
 0x446   :  { %1222 = vmatpush1.msra.mxu0 %v2911_v27  ;;  %1293 = vmatpush1.msra.mxu1 %v2914_v28 }
 0x447   :  { %1223 = vmatprep.subr.mxu0 %v2917_v29  ;;  %1294 = vmatprep.subr.mxu1 %v2920_v30 }
 0x448   :  { %1224 = vmatpush1.msra.mxu0 %v2923_v32  ;;  %1295 = vmatpush1.msra.mxu1 %v2926_v36 }
 0x449   :  { %1225 = vmatprep.subr.mxu0 %v2929_v37  ;;  %1296 = vmatprep.subr.mxu1 %v2932_v38 }
 0x44a   :  { %1226 = vmatpush1.msra.mxu0 %v2935_v39  ;;  %1297 = vmatpush1.msra.mxu1 %v2938_v40 }
 0x44b   :  { %1227 = vmatprep.subr.mxu0 %v2941_v41  ;;  %1298 = vmatprep.subr.mxu1 %v2944_v42 }
 0x44c   :  { %1228 = vmatpush1.msra.mxu0 %v2947_v43  ;;  %1299 = vmatpush1.msra.mxu1 %v2950_v44 }
 0x44d   :  { %1229 = vmatprep.subr.mxu0 %v2953_v45  ;;  %1300 = vmatprep.subr.mxu1 %v2956_v47 }
 0x44e   :  { %1230 = vmatpush1.msra.mxu0 %v2959_v49  ;;  %1301 = vmatpush1.msra.mxu1 %v2962_v51 }
 0x44f   :  { %1231 = vmatprep.subr.mxu0 %v2965_v53  ;;  %1302 = vmatprep.subr.mxu1 %v2968_v55 }
 0x450   :  { %1232 = vmatpush1.msra.mxu0 %v2971_v57  ;;  %1303 = vmatpush1.msra.mxu1 %v2974_v59 }
 0x451   :  { %1233 = vmatprep.subr.mxu0 %v2977_v61  ;;  %1304 = vmatprep.subr.mxu1 %v2980_v7 }
 0x452   :  { %1234 = vmatpush1.msra.mxu0 %v2983_v19  ;;  %1305 = vmatpush1.msra.mxu1 %v2986_v9 }
 0x453   :  { %1235 = vmatprep.subr.mxu0 %v2989_v54  ;;  %1306 = vmatprep.subr.mxu1 %v2992_v5 }
 0x454   :  { %1236 = vmatpush1.msra.mxu0 %v2995_v58  ;;  %1307 = vmatpush1.msra.mxu1 %v2998_v48  ;;  %v3016_v48 = vld [vmem:[#allocation11 + $0x38] sm:$0xff] }
 0x455   :  { %1237 = vmatprep.subr.mxu0 %v3001_v0  ;;  %1308 = vmatprep.subr.mxu1 %v3004_v56  ;;  %3446 = vst [vmem:[#allocation27_spill] sm:$0xff] %v3016_v48  ;;  %v3019_v0 = vld [vmem:[#allocation11 + $0x20] sm:$0xff]  ;;  %v3022_v56 = vld [vmem:[#allocation11 + $0x30] sm:$0xff] }
 0x456   :  { %1238 = vmatpush1.msra.mxu0 %v3007_v2  ;;  %1309 = vmatpush1.msra.mxu1 %v3010_v11  ;;  %3447 = vst [vmem:[#allocation37_spill] sm:$0xff] %v3019_v0  ;;  %3448 = vst [vmem:[#allocation28_spill] sm:$0xff] %v3022_v56  ;;  %v3025_v2 = vld [vmem:[#allocation11 + $0x8] sm:$0xff]  ;;  %v3028_v11 = vld [vmem:[#allocation11 + $0x18] sm:$0xff] }
 0x457   :  { %1239 = vmatprep.subr.mxu0 %v3013_v60  ;;  %1310 = vmatprep.subr.mxu1 %v3016_v48  ;;  %3449 = vst [vmem:[#allocation38_spill] sm:$0xff] %v3025_v2  ;;  %3450 = vst [vmem:[#allocation29_spill] sm:$0xff] %v3028_v11  ;;  %v3031_v60 = vld [vmem:[#allocation11] sm:$0xff]  ;;  %v3035_v48 = vld [vmem:[#allocation11 + $0x10] sm:$0xff] }
 0x458   :  { %1240 = vmatpush1.msra.mxu0 %v3019_v0  ;;  %1311 = vmatpush1.msra.mxu1 %v3022_v56  ;;  %3451 = vst [vmem:[#allocation39_spill] sm:$0xff] %v3031_v60  ;;  %3452 = vst [vmem:[#allocation31_spill] sm:$0xff] %v3035_v48  ;;  %v1030_v0 = vrot.slane %v2597_v1, 4 }
 0x459   :  { %1241 = vmatprep.subr.mxu0 %v3025_v2  ;;  %1312 = vmatprep.subr.mxu1 %v3028_v11  ;;  %v1029_v2 = vrot.slane %v3432_v35, 4 }
 0x45a   :  { %1242 = vmatpush1.msra.mxu0 %v3031_v60  ;;  %1275 = vmatprep.mubr.f32.mxu0 %v3428_v31 }
 0x45b   :  { %1313 = vmatpush1.msra.mxu1 %v3035_v48  ;;  %1346 = vmatprep.mubr.f32.mxu1 %v3428_v31  ;;  %v1031_v48 = vrot.slane %v2601_v12, 4 }
 0x45c   :  { %1385 = vmatprep.subr.mxu0 %v2834_v33  ;;  %1456 = vmatprep.subr.mxu1 %v2837_v34  ;;  %v1032_v33 = vrot.slane %v2604_v17, 4 }
 0x4fb   :  { %v1103_v56 = vpop.f32.mrf.mxu0  ;;  %v1174_v9 = vpop.f32.mrf.mxu1 }
 0x4fc   :  { %v1104_v11 = vadd.f32 %v1103_v56, %v1029_v2  ;;  %v1175_v31 = vadd.f32 %v1174_v9, %v1031_v48 }
 0x4fd   :  { %v1105_v58 = vpop.f32.mrf.mxu0  ;;  %v1176_v19 = vpop.f32.mrf.mxu1 }
 0x4fe   :  { %v1890_v60 = vmul.f32 -1.442695, %v1104_v11  ;;  %v1106_v5 = vadd.f32 %v1105_v58, %v1030_v0  ;;  %v1892_v34 = vmul.f32 -1.442695, %v1175_v31  ;;  %v1177_v7 = vadd.f32 %v1176_v19, %v1032_v33  ;;  %v3456_v19 = vld [vmem:[#allocation22_spill] sm:$0xff] }
 0x500   :  { %2030 = vpow2.f32 %v1890_v60  ;;  %v1891_v54 = vmul.f32 -1.442695, %v1106_v5 }
 0x502   :  { %2032 = vpow2.f32 %v1891_v54 }
 0x503   :  { %2034 = vpow2.f32 %v1892_v34 }
 0x504   :  { %2036 = vtanh.f32 %v1177_v7  ;;  %v3455_v7 = vld [vmem:[#allocation30_spill] sm:$0xff] }
 0x50d   :  { %v2031_v35 = vpop.eup %2030 }
 0x50e   :  { %v1188_v61 = vadd.f32 1.0, %v2031_v35 }
 0x50f   :  { %v2033_v56 = vpop.eup %2032 }
 0x510   :  { %2038 = vrcp.f32 %v1188_v61  ;;  %v1189_v2 = vadd.f32 1.0, %v2033_v56  ;;  %v2035_v58 = vpop.eup %2034  ;;  %v3454_v61 = vld [vmem:[#allocation21_spill] sm:$0xff]  ;;  %v3457_v56 = vld [vmem:[#allocation32_spill] sm:$0xff] }
 0x511   :  { %v2037_v5 = vpop.eup %2036  ;;  %v1190_v60 = vadd.f32 1.0, %v2035_v58  ;;  %v3459_v58 = vld [vmem:[#allocation33_spill] sm:$0xff] }
 0x512   :  { %2040 = vrcp.f32 %v1189_v2  ;;  %v3458_v2 = vld [vmem:[#allocation23_spill] sm:$0xff] }
 0x513   :  { %2042 = vrcp.f32 %v1190_v60  ;;  %v3464_v60 = vld [vmem:[#allocation26_spill] sm:$0xff] }
 0x51d   :  { %v2039_v54 = vpop.eup %2038 }
 0x51e   :  { %v1199_v0 = vmul.f32 %v2039_v54, %v2037_v5  ;;  %v3460_v5 = vld [vmem:[#allocation24_spill] sm:$0xff]  ;;  %v3461_v54 = vld [vmem:[#allocation34_spill] sm:$0xff] }
 0x51f   :  { %v2041_v11 = vpop.eup %2040 }
 0x520   :  { %v1198_v9 = vmul.f32 %v2041_v11, %v2845_v62  ;;  %v2043_v31 = vpop.eup %2042  ;;  %v3463_v11 = vld [vmem:[#allocation35_spill] sm:$0xff] }
 0x522   :  { %v3046_v48 = vadd.f32 %v1199_v0, %v1198_v9  ;;  %v3462_v0 = vld [vmem:[#allocation25_spill] sm:$0xff]  ;;  %v3465_v9 = vld [vmem:[#allocation36_spill] sm:$0xff] }
 0x524   :  { %2044 = vtanh.f32 %v3046_v48 }
 0x531   :  { %v2045_v33 = vpop.eup %2044 }
 0x532   :  { %v1202_v34 = vmul.f32 %v2045_v33, %v2043_v31  ;;  %v3466_v31 = vld [vmem:[#allocation27_spill] sm:$0xff]  ;;  %v3467_v33 = vld [vmem:[#allocation37_spill] sm:$0xff] }
 0x534   :  { %1276 = vmatmul.mubr.f32.vlgmr.msra.gmra.mxu0 %v1202_v34  ;;  %v1735_v35 = vrot.slane %v1202_v34, 4  ;;  %1347 = vmatmul.mubr.f32.vlgmr.msra.gmra.mxu1 %v1202_v34  ;;  %v3468_v34 = vld [vmem:[#allocation28_spill] sm:$0xff] }
 0x535   :  { %1386 = vmatpush1.msra.mxu0 %v2848_v46  ;;  %1457 = vmatpush1.msra.mxu1 %v2851_v15 }
 0x536   :  { %1387 = vmatprep.subr.mxu0 %v2854_v52  ;;  %1458 = vmatprep.subr.mxu1 %v2857_v50  ;;  %v3054_v62 = vsel %vm1752_vm4, %v2861_v63, %v1735_v35  ;;  %v3453_v63 = vld [vmem:[#allocation42_spill] sm:$0xff] }
 0x537   :  { %1388 = vmatpush1.msra.mxu0 %v2863_v4  ;;  %1459 = vmatpush1.msra.mxu1 %v2866_v6  ;;  %v3469_v35 = vld [vmem:[#allocation38_spill] sm:$0xff] }
 0x538   :  { %1389 = vmatprep.subr.mxu0 %v2869_v8  ;;  %1460 = vmatprep.subr.mxu1 %v2872_v10 }
 0x539   :  { %1390 = vmatpush1.msra.mxu0 %v2875_v13  ;;  %1461 = vmatpush1.msra.mxu1 %v2878_v3 }
 0x53a   :  { %1391 = vmatprep.subr.mxu0 %v2881_v14  ;;  %1462 = vmatprep.subr.mxu1 %v2884_v16 }
 0x53b   :  { %1392 = vmatpush1.msra.mxu0 %v2887_v18  ;;  %1463 = vmatpush1.msra.mxu1 %v2890_v20 }
 0x53c   :  { %1393 = vmatprep.subr.mxu0 %v2893_v21  ;;  %1464 = vmatprep.subr.mxu1 %v2896_v22 }
 0x53d   :  { %1394 = vmatpush1.msra.mxu0 %v2899_v23  ;;  %1465 = vmatpush1.msra.mxu1 %v2902_v24 }
 0x53e   :  { %1395 = vmatprep.subr.mxu0 %v2905_v25  ;;  %1466 = vmatprep.subr.mxu1 %v2908_v26 }
 0x53f   :  { %1396 = vmatpush1.msra.mxu0 %v2911_v27  ;;  %1467 = vmatpush1.msra.mxu1 %v2914_v28 }
 0x540   :  { %1397 = vmatprep.subr.mxu0 %v2917_v29  ;;  %1468 = vmatprep.subr.mxu1 %v2920_v30 }
 0x541   :  { %1398 = vmatpush1.msra.mxu0 %v2923_v32  ;;  %1469 = vmatpush1.msra.mxu1 %v2926_v36 }
 0x542   :  { %1399 = vmatprep.subr.mxu0 %v2929_v37  ;;  %1470 = vmatprep.subr.mxu1 %v2932_v38 }
 0x543   :  { %1400 = vmatpush1.msra.mxu0 %v2935_v39  ;;  %1471 = vmatpush1.msra.mxu1 %v2938_v40 }
 0x544   :  { %1401 = vmatprep.subr.mxu0 %v2941_v41  ;;  %1472 = vmatprep.subr.mxu1 %v2944_v42 }
 0x545   :  { %1402 = vmatpush1.msra.mxu0 %v2947_v43  ;;  %1473 = vmatpush1.msra.mxu1 %v2950_v44 }
 0x546   :  { %1403 = vmatprep.subr.mxu0 %v2953_v45  ;;  %1474 = vmatprep.subr.mxu1 %v2956_v47 }
 0x547   :  { %1404 = vmatpush1.msra.mxu0 %v2959_v49  ;;  %1475 = vmatpush1.msra.mxu1 %v2962_v51 }
 0x548   :  { %1405 = vmatprep.subr.mxu0 %v2965_v53  ;;  %1476 = vmatprep.subr.mxu1 %v2968_v55 }
 0x549   :  { %1406 = vmatpush1.msra.mxu0 %v2971_v57  ;;  %1477 = vmatpush1.msra.mxu1 %v2974_v59 }
 0x54a   :  { %1407 = vmatprep.subr.mxu0 %v3453_v63  ;;  %1478 = vmatprep.subr.mxu1 %v3454_v61 }
 0x54b   :  { %1408 = vmatpush1.msra.mxu0 %v3455_v7  ;;  %1479 = vmatpush1.msra.mxu1 %v3456_v19 }
 0x54c   :  { %1409 = vmatprep.subr.mxu0 %v3457_v56  ;;  %1480 = vmatprep.subr.mxu1 %v3458_v2 }
 0x54d   :  { %1410 = vmatpush1.msra.mxu0 %v3459_v58  ;;  %1481 = vmatpush1.msra.mxu1 %v3460_v5  ;;  %v3470_v58 = vld [vmem:[#allocation29_spill] sm:$0xff]  ;;  %v3471_v5 = vld [vmem:[#allocation39_spill] sm:$0xff] }
 0x54e   :  { %1411 = vmatprep.subr.mxu0 %v3461_v54  ;;  %1482 = vmatprep.subr.mxu1 %v3462_v0  ;;  %v3472_v54 = vmov 0.0   ;;  %v3473_v0 = vld [vmem:[#allocation31_spill] sm:$0xff] }
 0x54f   :  { %1412 = vmatpush1.msra.mxu0 %v3463_v11  ;;  %1483 = vmatpush1.msra.mxu1 %v3464_v60  ;;  %v3474_v60 = vld [vmem:[#allocation19_spill] sm:$0xff] }
 0x550   :  { %1413 = vmatprep.subr.mxu0 %v3465_v9  ;;  %1484 = vmatprep.subr.mxu1 %v3466_v31  ;;  %v3475_v9 = vld [vmem:[#allocation20_spill] sm:$0xff]  ;;  %v3476_v31 = vld [vmem:[#allocation41_spill] sm:$0xff] }
 0x551   :  { %1414 = vmatpush1.msra.mxu0 %v3467_v33  ;;  %1485 = vmatpush1.msra.mxu1 %v3468_v34  ;;  %v1203_v33 = vrot.slane %v3476_v31, 5 }
 0x552   :  { %1415 = vmatprep.subr.mxu0 %v3469_v35  ;;  %1486 = vmatprep.subr.mxu1 %v3470_v58  ;;  %v1204_v35 = vrot.slane %v2597_v1, 5 }
 0x553   :  { %1416 = vmatpush1.msra.mxu0 %v3471_v5  ;;  %1449 = vmatprep.mubr.f32.mxu0 %v3472_v54 }
 0x554   :  { %1487 = vmatpush1.msra.mxu1 %v3473_v0  ;;  %1520 = vmatprep.mubr.f32.mxu1 %v3472_v54  ;;  %v1205_v0 = vrot.slane %v2601_v12, 5 }
 0x555   :  { %1559 = vmatprep.subr.mxu0 %v3474_v60  ;;  %1630 = vmatprep.subr.mxu1 %v3475_v9  ;;  %v1206_v60 = vrot.slane %v2604_v17, 5 }
 0x5f4   :  { %v1277_v11 = vpop.f32.mrf.mxu0  ;;  %v1348_v19 = vpop.f32.mrf.mxu1 }
 0x5f5   :  { %v1278_v34 = vadd.f32 %v1277_v11, %v1203_v33  ;;  %v1349_v54 = vadd.f32 %v1348_v19, %v1205_v0 }
 0x5f6   :  { %v1279_v2 = vpop.f32.mrf.mxu0  ;;  %v1350_v7 = vpop.f32.mrf.mxu1 }
 0x5f7   :  { %v1893_v58 = vmul.f32 -1.442695, %v1278_v34  ;;  %v1280_v56 = vadd.f32 %v1279_v2, %v1204_v35  ;;  %v1895_v9 = vmul.f32 -1.442695, %v1349_v54  ;;  %v1351_v61 = vadd.f32 %v1350_v7, %v1206_v60 }
 0x5f9   :  { %2046 = vpow2.f32 %v1893_v58  ;;  %v1894_v5 = vmul.f32 -1.442695, %v1280_v56 }
 0x5fb   :  { %2048 = vpow2.f32 %v1894_v5 }
 0x5fc   :  { %2050 = vpow2.f32 %v1895_v9 }
 0x5fd   :  { %2052 = vtanh.f32 %v1351_v61 }
 0x606   :  { %v2047_v31 = vpop.eup %2046 }
 0x607   :  { %v1362_v63 = vadd.f32 1.0, %v2047_v31 }
 0x608   :  { %v2049_v11 = vpop.eup %2048 }
 0x609   :  { %2054 = vrcp.f32 %v1362_v63  ;;  %v1363_v33 = vadd.f32 1.0, %v2049_v11  ;;  %v2051_v2 = vpop.eup %2050 }
 0x60a   :  { %v2053_v56 = vpop.eup %2052  ;;  %v1364_v35 = vadd.f32 1.0, %v2051_v2 }
 0x60b   :  { %2056 = vrcp.f32 %v1363_v33 }
 0x60c   :  { %2058 = vrcp.f32 %v1364_v35 }
 0x616   :  { %v2055_v58 = vpop.eup %2054 }
 0x617   :  { %v1373_v5 = vmul.f32 %v2055_v58, %v2053_v56 }
 0x618   :  { %v2057_v34 = vpop.eup %2056 }
 0x619   :  { %v1372_v19 = vmul.f32 %v2057_v34, %v3046_v48  ;;  %v2059_v7 = vpop.eup %2058 }
 0x61b   :  { %v3123_v0 = vadd.f32 %v1373_v5, %v1372_v19  ;;  %v1779_v19 = vld [vmem:[#allocation12 + $0x78] sm:$0xff] }
 0x61d   :  { %2060 = vtanh.f32 %v3123_v0 }
 0x62a   :  { %v2061_v54 = vpop.eup %2060 }
 0x62b   :  { %v1376_v31 = vmul.f32 %v2061_v54, %v2059_v7  ;;  %v1777_v7 = vld [vmem:[#allocation12 + $0x68] sm:$0xff]  ;;  %v1776_v54 = vld [vmem:[#allocation12 + $0x60] sm:$0xff] }
 0x62d   :  { %1450 = vmatmul.mubr.f32.vlgmr.msra.gmra.mxu0 %v1376_v31  ;;  %v1738_v63 = vrot.slane %v1376_v31, 3  ;;  %1521 = vmatmul.mubr.f32.vlgmr.msra.gmra.mxu1 %v1376_v31  ;;  %v1775_v31 = vld [vmem:[#allocation12 + $0x58] sm:$0xff] }
 0x62e   :  { %1560 = vmatpush1.msra.mxu0 %v2848_v46  ;;  %1631 = vmatpush1.msra.mxu1 %v2851_v15  ;;  %v3477_v46 = vld [vmem:[#allocation42_spill] sm:$0xff]  ;;  %v3478_v15 = vld [vmem:[#allocation21_spill] sm:$0xff] }
 0x62f   :  { %1561 = vmatprep.subr.mxu0 %v2854_v52  ;;  %1632 = vmatprep.subr.mxu1 %v2857_v50  ;;  %v3131_v48 = vsel %vm1754_vm5, %v3054_v62, %v1738_v63  ;;  %v3479_v52 = vld [vmem:[#allocation30_spill] sm:$0xff]  ;;  %v1774_v63 = vld [vmem:[#allocation12 + $0x50] sm:$0xff] }
 0x630   :  { %1562 = vmatpush1.msra.mxu0 %v2863_v4  ;;  %1633 = vmatpush1.msra.mxu1 %v2866_v6  ;;  %v3480_v50 = vld [vmem:[#allocation22_spill] sm:$0xff]  ;;  %v3481_v4 = vld [vmem:[#allocation32_spill] sm:$0xff]  ;;  %v3482_v6 = vld [vmem:[#allocation23_spill] sm:$0xff] }
 0x631   :  { %1563 = vmatprep.subr.mxu0 %v2869_v8  ;;  %1634 = vmatprep.subr.mxu1 %v2872_v10  ;;  %v3483_v8 = vld [vmem:[#allocation33_spill] sm:$0xff]  ;;  %v3484_v10 = vld [vmem:[#allocation24_spill] sm:$0xff] }
 0x632   :  { %1564 = vmatpush1.msra.mxu0 %v2875_v13  ;;  %1635 = vmatpush1.msra.mxu1 %v2878_v3  ;;  %v3485_v13 = vld [vmem:[#allocation34_spill] sm:$0xff]  ;;  %v3486_v3 = vld [vmem:[#allocation25_spill] sm:$0xff] }
 0x633   :  { %1565 = vmatprep.subr.mxu0 %v2881_v14  ;;  %1636 = vmatprep.subr.mxu1 %v2884_v16  ;;  %v3487_v14 = vld [vmem:[#allocation35_spill] sm:$0xff]  ;;  %v3488_v16 = vld [vmem:[#allocation26_spill] sm:$0xff] }
 0x634   :  { %1566 = vmatpush1.msra.mxu0 %v2887_v18  ;;  %1637 = vmatpush1.msra.mxu1 %v2890_v20  ;;  %v3489_v18 = vld [vmem:[#allocation36_spill] sm:$0xff]  ;;  %v3490_v20 = vld [vmem:[#allocation27_spill] sm:$0xff] }
 0x635   :  { %1567 = vmatprep.subr.mxu0 %v2893_v21  ;;  %1638 = vmatprep.subr.mxu1 %v2896_v22  ;;  %v3491_v21 = vld [vmem:[#allocation37_spill] sm:$0xff]  ;;  %v3492_v22 = vld [vmem:[#allocation28_spill] sm:$0xff] }
 0x636   :  { %1568 = vmatpush1.msra.mxu0 %v2899_v23  ;;  %1639 = vmatpush1.msra.mxu1 %v2902_v24  ;;  %v3493_v23 = vld [vmem:[#allocation38_spill] sm:$0xff]  ;;  %v3494_v24 = vld [vmem:[#allocation29_spill] sm:$0xff] }
 0x637   :  { %1569 = vmatprep.subr.mxu0 %v2905_v25  ;;  %1640 = vmatprep.subr.mxu1 %v2908_v26  ;;  %v3495_v25 = vld [vmem:[#allocation39_spill] sm:$0xff]  ;;  %v3496_v26 = vmov 0.0  }
 0x638   :  { %1570 = vmatpush1.msra.mxu0 %v2911_v27  ;;  %1641 = vmatpush1.msra.mxu1 %v2914_v28  ;;  %v3497_v27 = vld [vmem:[#allocation31_spill] sm:$0xff]  ;;  %v3498_v28 = vld [vmem:[#allocation41_spill] sm:$0xff] }
 0x639   :  { %1571 = vmatprep.subr.mxu0 %v2917_v29  ;;  %1642 = vmatprep.subr.mxu1 %v2920_v30  ;;  %v1377_v29 = vrot.slane %v3498_v28, 6 }
 0x63a   :  { %1572 = vmatpush1.msra.mxu0 %v2923_v32  ;;  %1643 = vmatpush1.msra.mxu1 %v2926_v36  ;;  %v1378_v36 = vrot.slane %v2597_v1, 6 }
 0x63b   :  { %1573 = vmatprep.subr.mxu0 %v2929_v37  ;;  %1644 = vmatprep.subr.mxu1 %v2932_v38 }
 0x63c   :  { %1574 = vmatpush1.msra.mxu0 %v2935_v39  ;;  %1645 = vmatpush1.msra.mxu1 %v2938_v40 }
 0x63d   :  { %1575 = vmatprep.subr.mxu0 %v2941_v41  ;;  %1646 = vmatprep.subr.mxu1 %v2944_v42  ;;  %v1379_v42 = vrot.slane %v2601_v12, 6 }
 0x63e   :  { %1576 = vmatpush1.msra.mxu0 %v2947_v43  ;;  %1647 = vmatpush1.msra.mxu1 %v2950_v44 }
 0x63f   :  { %1577 = vmatprep.subr.mxu0 %v2953_v45  ;;  %1648 = vmatprep.subr.mxu1 %v2956_v47  ;;  %v1380_v45 = vrot.slane %v2604_v17, 6 }
 0x640   :  { %1578 = vmatpush1.msra.mxu0 %v2959_v49  ;;  %1649 = vmatpush1.msra.mxu1 %v2962_v51 }
 0x641   :  { %1579 = vmatprep.subr.mxu0 %v2965_v53  ;;  %1650 = vmatprep.subr.mxu1 %v2968_v55 }
 0x642   :  { %1580 = vmatpush1.msra.mxu0 %v2971_v57  ;;  %1651 = vmatpush1.msra.mxu1 %v2974_v59 }
 0x643   :  { %1581 = vmatprep.subr.mxu0 %v3477_v46  ;;  %1652 = vmatprep.subr.mxu1 %v3478_v15  ;;  %v1772_v46 = vld [vmem:[#allocation12 + $0x40] sm:$0xff]  ;;  %v1771_v15 = vld [vmem:[#allocation12 + $0x38] sm:$0xff] }
 0x644   :  { %1582 = vmatpush1.msra.mxu0 %v3479_v52  ;;  %1653 = vmatpush1.msra.mxu1 %v3480_v50  ;;  %v1770_v52 = vld [vmem:[#allocation12 + $0x30] sm:$0xff]  ;;  %v1769_v50 = vld [vmem:[#allocation12 + $0x28] sm:$0xff] }
 0x645   :  { %1583 = vmatprep.subr.mxu0 %v3481_v4  ;;  %1654 = vmatprep.subr.mxu1 %v3482_v6  ;;  %v1768_v4 = vld [vmem:[#allocation12 + $0x20] sm:$0xff]  ;;  %v1767_v6 = vld [vmem:[#allocation12 + $0x18] sm:$0xff] }
 0x646   :  { %1584 = vmatpush1.msra.mxu0 %v3483_v8  ;;  %1655 = vmatpush1.msra.mxu1 %v3484_v10  ;;  %v1766_v8 = vld [vmem:[#allocation12 + $0x10] sm:$0xff]  ;;  %v1765_v10 = vld [vmem:[#allocation12 + $0x8] sm:$0xff] }
 0x647   :  { %1585 = vmatprep.subr.mxu0 %v3485_v13  ;;  %1656 = vmatprep.subr.mxu1 %v3486_v3  ;;  %v1764_v13 = vld [vmem:[#allocation12] sm:$0xff]  ;;  %v1551_v3 = vrot.slane %v3498_v28, 7 }
 0x648   :  { %1586 = vmatpush1.msra.mxu0 %v3487_v14  ;;  %1657 = vmatpush1.msra.mxu1 %v3488_v16 }
 0x649   :  { %1587 = vmatprep.subr.mxu0 %v3489_v18  ;;  %1658 = vmatprep.subr.mxu1 %v3490_v20  ;;  %v1552_v18 = vrot.slane %v2597_v1, 7 }
 0x64a   :  { %1588 = vmatpush1.msra.mxu0 %v3491_v21  ;;  %1659 = vmatpush1.msra.mxu1 %v3492_v22 }
 0x64b   :  { %1589 = vmatprep.subr.mxu0 %v3493_v23  ;;  %1660 = vmatprep.subr.mxu1 %v3494_v24 }
 0x64c   :  { %1590 = vmatpush1.msra.mxu0 %v3495_v25  ;;  %1623 = vmatprep.mubr.f32.mxu0 %v3496_v26  ;;  %v1553_v25 = vrot.slane %v2601_v12, 7 }
 0x64d   :  { %1661 = vmatpush1.msra.mxu1 %v3497_v27  ;;  %1694 = vmatprep.mubr.f32.mxu1 %v3496_v26 }
 0x64e   :  { %1920 = vmatprep.subr.mxu0 %v3496_v26 }
 0x6ed   :  { %v1451_v30 = vpop.f32.mrf.mxu0  ;;  %v1522_v41 = vpop.f32.mrf.mxu1 }
 0x6ee   :  { %v1452_v32 = vadd.f32 %v1451_v30, %v1377_v29  ;;  %v1523_v43 = vadd.f32 %v1522_v41, %v1379_v42 }
 0x6ef   :  { %v1453_v37 = vpop.f32.mrf.mxu0  ;;  %v1524_v44 = vpop.f32.mrf.mxu1 }
 0x6f0   :  { %v1896_v38 = vmul.f32 -1.442695, %v1452_v32  ;;  %v1454_v39 = vadd.f32 %v1453_v37, %v1378_v36  ;;  %v1898_v47 = vmul.f32 -1.442695, %v1523_v43  ;;  %v1525_v49 = vadd.f32 %v1524_v44, %v1380_v45 }
 0x6f2   :  { %2062 = vpow2.f32 %v1896_v38  ;;  %v1897_v40 = vmul.f32 -1.442695, %v1454_v39 }
 0x6f4   :  { %2064 = vpow2.f32 %v1897_v40 }
 0x6f5   :  { %2066 = vpow2.f32 %v1898_v47 }
 0x6f6   :  { %2068 = vtanh.f32 %v1525_v49 }
 0x6ff   :  { %v2063_v51 = vpop.eup %2062 }
 0x700   :  { %v1536_v53 = vadd.f32 1.0, %v2063_v51 }
 0x701   :  { %v2065_v55 = vpop.eup %2064 }
 0x702   :  { %2070 = vrcp.f32 %v1536_v53  ;;  %v1537_v57 = vadd.f32 1.0, %v2065_v55  ;;  %v2067_v59 = vpop.eup %2066  ;;  %v1902_v53 = vld [vmem:[%s3238_s5] ss:$0 sm:$0xff] }
 0x703   :  { %v2069_v62 = vpop.eup %2068  ;;  %v1538_v11 = vadd.f32 1.0, %v2067_v59 }
 0x704   :  { %2072 = vrcp.f32 %v1537_v57 }
 0x705   :  { %2074 = vrcp.f32 %v1538_v11 }
 0x70f   :  { %v2071_v61 = vpop.eup %2070 }
 0x710   :  { %v1547_v60 = vmul.f32 %v2071_v61, %v2069_v62 }
 0x711   :  { %v2073_v9 = vpop.eup %2072 }
 0x712   :  { %v1546_v33 = vmul.f32 %v2073_v9, %v3123_v0  ;;  %v2075_v56 = vpop.eup %2074  ;;  %v1778_v0 = vld [vmem:[#allocation12 + $0x70] sm:$0xff] }
 0x714   :  { %v3199_v2 = vadd.f32 %v1547_v60, %v1546_v33 }
 0x716   :  { %2076 = vtanh.f32 %v3199_v2 }
 0x723   :  { %v2077_v58 = vpop.eup %2076 }
 0x724   :  { %v1550_v5 = vmul.f32 %v2077_v58, %v2075_v56 }
 0x726   :  { %1624 = vmatmul.mubr.f32.vlgmr.msra.gmra.mxu0 %v1550_v5  ;;  %1695 = vmatmul.mubr.f32.vlgmr.msra.gmra.mxu1 %v1550_v5  ;;  %v1741_v34 = vrot.slane %v1550_v5, 2 }
 0x727   :  { %1921 = vmatpush3.msra.mxu0 %v1779_v19  ;;  %1952 = vmatprep.mubr.msk.f32.mxu0 %vm2275_vm7, %v3496_v26 }
 0x728   :  { %v3203_v35 = vsel %vm1756_vm6, %v3131_v48, %v1741_v34  ;;  %1922 = vmatprep.subr.mxu0 %v3496_v26  ;;  %v1773_v48 = vld [vmem:[#allocation12 + $0x48] sm:$0xff] }
 0x729   :  { %1923 = vmatpush3.msra.mxu0 %v1778_v0 }
 0x72a   :  { %1924 = vmatprep.subr.mxu0 %v3496_v26 }
 0x72b   :  { %1925 = vmatpush3.msra.mxu0 %v1777_v7 }
 0x72c   :  { %1926 = vmatprep.subr.mxu0 %v3496_v26 }
 0x72d   :  { %1927 = vmatpush3.msra.mxu0 %v1776_v54 }
 0x72e   :  { %1928 = vmatprep.subr.mxu0 %v3496_v26 }
 0x72f   :  { %1929 = vmatpush3.msra.mxu0 %v1775_v31 }
 0x730   :  { %1930 = vmatprep.subr.mxu0 %v3496_v26 }
 0x731   :  { %1931 = vmatpush3.msra.mxu0 %v1774_v63 }
 0x732   :  { %1932 = vmatprep.subr.mxu0 %v3496_v26 }
 0x733   :  { %1933 = vmatpush3.msra.mxu0 %v1773_v48 }
 0x734   :  { %1934 = vmatprep.subr.mxu0 %v3496_v26 }
 0x735   :  { %1935 = vmatpush3.msra.mxu0 %v1772_v46 }
 0x736   :  { %1936 = vmatprep.subr.mxu0 %v3496_v26 }
 0x737   :  { %1937 = vmatpush3.msra.mxu0 %v1771_v15 }
 0x738   :  { %1938 = vmatprep.subr.mxu0 %v3496_v26 }
 0x739   :  { %1939 = vmatpush3.msra.mxu0 %v1770_v52 }
 0x73a   :  { %1940 = vmatprep.subr.mxu0 %v3496_v26 }
 0x73b   :  { %1941 = vmatpush3.msra.mxu0 %v1769_v50 }
 0x73c   :  { %1942 = vmatprep.subr.mxu0 %v3496_v26 }
 0x73d   :  { %1943 = vmatpush3.msra.mxu0 %v1768_v4 }
 0x73e   :  { %1944 = vmatprep.subr.mxu0 %v3496_v26 }
 0x73f   :  { %1945 = vmatpush3.msra.mxu0 %v1767_v6 }
 0x740   :  { %1946 = vmatprep.subr.mxu0 %v3496_v26 }
 0x741   :  { %1947 = vmatpush3.msra.mxu0 %v1766_v8 }
 0x742   :  { %1948 = vmatprep.subr.mxu0 %v3496_v26 }
 0x743   :  { %1949 = vmatpush3.msra.mxu0 %v1765_v10 }
 0x744   :  { %1950 = vmatprep.subr.mxu0 %v3496_v26  ;;  %v1554_v26 = vrot.slane %v2604_v17, 7 }
 0x745   :  { %1951 = vmatpush3.msra.mxu0 %v1764_v13 }
 0x7e6   :  { %v1625_v14 = vpop.f32.mrf.mxu0  ;;  %v1696_v24 = vpop.f32.mrf.mxu1 }
 0x7e7   :  { %v1626_v16 = vadd.f32 %v1625_v14, %v1551_v3  ;;  %v1697_v27 = vadd.f32 %v1696_v24, %v1553_v25 }
 0x7e8   :  { %v1627_v20 = vpop.f32.mrf.mxu0  ;;  %v1698_v29 = vpop.f32.mrf.mxu1 }
 0x7e9   :  { %v1899_v21 = vmul.f32 -1.442695, %v1626_v16  ;;  %v1628_v22 = vadd.f32 %v1627_v20, %v1552_v18  ;;  %v1901_v30 = vmul.f32 -1.442695, %v1697_v27  ;;  %v1699_v32 = vadd.f32 %v1698_v29, %v1554_v26 }
 0x7eb   :  { %2078 = vpow2.f32 %v1899_v21  ;;  %v1900_v23 = vmul.f32 -1.442695, %v1628_v22 }
 0x7ed   :  { %2080 = vpow2.f32 %v1900_v23 }
 0x7ee   :  { %2082 = vpow2.f32 %v1901_v30 }
 0x7ef   :  { %2084 = vtanh.f32 %v1699_v32 }
 0x7f8   :  { %v2079_v28 = vpop.eup %2078 }
 0x7f9   :  { %v1710_v36 = vadd.f32 1.0, %v2079_v28 }
 0x7fa   :  { %v2081_v37 = vpop.eup %2080 }
 0x7fb   :  { %2086 = vrcp.f32 %v1710_v36  ;;  %v1711_v1 = vadd.f32 1.0, %v2081_v37  ;;  %v2083_v38 = vpop.eup %2082 }
 0x7fc   :  { %v2085_v39 = vpop.eup %2084  ;;  %v1712_v12 = vadd.f32 1.0, %v2083_v38 }
 0x7fd   :  { %2088 = vrcp.f32 %v1711_v1 }
 0x7fe   :  { %2090 = vrcp.f32 %v1712_v12 }
 0x808   :  { %v2087_v40 = vpop.eup %2086 }
 0x809   :  { %v1721_v41 = vmul.f32 %v2087_v40, %v2085_v39 }
 0x80a   :  { %v2089_v42 = vpop.eup %2088 }
 0x80b   :  { %v1720_v43 = vmul.f32 %v2089_v42, %v3199_v2  ;;  %v2091_v17 = vpop.eup %2090 }
 0x80d   :  { %v1722_v44 = vadd.f32 %v1721_v41, %v1720_v43 }
 0x80f   :  { %2092 = vtanh.f32 %v1722_v44  ;;  %1762 = vst [vmem:[#allocation5] sm:$0x1] %v1722_v44 }
 0x81c   :  { %v2093_v45 = vpop.eup %2092 }
 0x81d   :  { %v1724_v47 = vmul.f32 %v2093_v45, %v2091_v17 }
 0x81f   :  { %v1744_v49 = vrot.slane %v1724_v47, 1  ;;  %1761 = vst [vmem:[#allocation4] sm:$0x1] %v1724_v47 }
 0x821   :  { %v1759_v51 = vsel %vm1758_vm8, %v3203_v35, %v1744_v49 }
 0x822   :  { %1953 = vmatmul.mubr.f32.vlgmr.msra.gmra.mxu0 %v1759_v51 }
 0x8e2   :  { %v1853_v55 = vpop.f32.mrf.mxu0 }
 0x8e3   :  { %v1854_v57 = vadd.f32 %v1902_v53, %v1853_v55 }
 0x8e4   :  { %v1954_v59 = vpop.f32.mrf.mxu0 }
 0x8e5   :  { %v1857_v62 = vmax.f32 %v1854_v57, 0.0 }
 0x8e7   :  { %1858 = vst [vmem:[#allocation14] sm:$0xff] %v1857_v62 }
 0x8e8   :  { %2249 = shalt.err (!%p2246_p10)
}
 0x8e9   :  { %1868 = dma.vmem_to_hbm [thread:$0]  %s1866_s21, 128, %s3239_s6, [#allocation8]  }
 0x8ea   :  { %2264 = dma.done.wait [#allocation8], 128  }
 0x8eb   :  { %2265 = vsyncadd [#allocation8], 4294967168 }
 0x8ec   :  { %1872 = vsyncpa [#allocation7], 1 }
 0x8ed   :  { %1873 = vsyncpa [#allocation10], 1 }
 0x8ee   :  { %1874 = vsyncpa [#allocation13], 1 }
 0x8ef   :  { %1875 = vsyncpa [#allocation8], 1 }

</bundles_post_ra>
